<compile_context>
chip_gen: v6e
topology: v6e:2x2x1
jax: 0.10.0
libtpu: 0.0.40
codegen_flags: <defaults>
</compile_context>

<pallas_src>
import functools
import math

import jax
import jax.numpy as jnp
from jax.experimental import pallas as pl
from jax.experimental.pallas import tpu as pltpu


# ----------------------------------------------------------------------------
# Positional encoding (espnet PositionalEncoding table)
# ----------------------------------------------------------------------------
def make_positional_encoding(max_len, d_model):
    position = jnp.arange(max_len, dtype=jnp.float32)[:, None]
    div_term = jnp.exp(
        jnp.arange(0, d_model, 2, dtype=jnp.float32) * -(math.log(10000.0) / d_model)
    )
    pe = jnp.zeros((max_len, d_model), dtype=jnp.float32)
    pe = pe.at[:, 0::2].set(jnp.sin(position * div_term))
    pe = pe.at[:, 1::2].set(jnp.cos(position * div_term))
    return pe


# ----------------------------------------------------------------------------
# Fused Pallas kernel: conv1 + ReLU + conv2 + ReLU + flatten + Linear + PosEnc
# ----------------------------------------------------------------------------
def _subsample6_kernel(x_ref, w1_ref, w2_ref, wl_ref, b1_ref, b2_ref, bl_ref,
                       pe_ref, o_ref, *, t2_tile, odim, f2_dim, scale):
    m1 = t2_tile + 1                        # conv1 rows per phase needed per tile
    w1s = [w1_ref[di] for di in range(3)]   # (idim, F1out*odim) bf16, VMEM resident
    b1r = b1_ref[...]                       # (1, F1out*odim) f32
    b2r = b2_ref[...]                       # (1, odim) f32
    blr = bl_ref[...]                       # (1, odim) f32
    c1 = b1r.shape[-1]

    # --- conv1 (3x3, stride 2) + ReLU, one pass per phase r = t1 % 3 --------
    # x_ref is the 6-phase split input: x_ref[ph, j, f] = x[6*(t2_0 + j) + ph, f]
    y1 = []
    for r in range(3):
        acc = jnp.zeros((m1, c1), jnp.float32)
        for di in range(3):
            s = 2 * r + di                  # needed x frame offset = 6*m + s
            xt = x_ref[s % 6, s // 6: s // 6 + m1, :].astype(jnp.bfloat16)
            acc = acc + jnp.dot(xt, w1s[di], preferred_element_type=jnp.float32)
        y1.append(jnp.maximum(acc + b1r, 0.0))     # (m1, F1out*odim) f32

    # --- conv2 (5x5, stride 3): 5 time taps x F2 freqs, dense K = 5*odim ----
    y2 = [jnp.zeros((t2_tile, odim), jnp.float32) for _ in range(f2_dim)]
    for q in range(5):
        lhs_q = y1[q % 3][q // 3: q // 3 + t2_tile, :]
        w2q = w2_ref[q]                     # (5*odim, odim) bf16
        for f2 in range(f2_dim):
            blk = lhs_q[:, 3 * f2 * odim: (3 * f2 + 5) * odim]
            y2[f2] = y2[f2] + jnp.dot(blk.astype(jnp.bfloat16), w2q,
                                      preferred_element_type=jnp.float32)

    # --- ReLU -> Linear (flatten order folded into wl) -> *sqrt(d) + pe -----
    acc_o = jnp.zeros((t2_tile, odim), jnp.float32)
    for f2 in range(f2_dim):
        a = jnp.maximum(y2[f2] + b2r, 0.0).astype(jnp.bfloat16)
        acc_o = acc_o + jnp.dot(a, wl_ref[f2], preferred_element_type=jnp.float32)
    out = (acc_o + blr) * scale + pe_ref[...]
    o_ref[...] = out.astype(o_ref.dtype)


# ----------------------------------------------------------------------------
# Forward
# ----------------------------------------------------------------------------
def conv2d_subsampling6_forward(x, x_mask, params, odim, *, t2_tile=None):
    """x: (B, T, idim) f32, x_mask: (B, 1, T) bool."""
    B, T, idim = x.shape
    assert odim % 2 == 0, "positional encoding assumes even odim"
    T1 = (T - 3) // 2 + 1
    F1 = (idim - 3) // 2 + 1
    T2 = (T1 - 5) // 3 + 1
    F2 = (F1 - 5) // 3 + 1
    assert T2 >= 1 and F2 >= 1, "input too short for 1/6 subsampling"
    F1out = 3 * F2 + 2                      # conv1 freq bins conv2 actually reads
    C1 = F1out * odim

    if t2_tile is None:
        t2_tile = 8 if T2 <= 64 else 16     # output rows per grid step (mult of 8)
    n_tiles = -(-T2 // t2_tile)
    T2_pad = n_tiles * t2_tile
    J = t2_tile + 2                         # phase-rows of x per tile (w/ halo)
    Jtot = T2_pad + 2

    w1, b1 = params["w1"], params["b1"]
    w2, b2 = params["w2"], params["b2"]
    wl, bl = params["wl"], params["bl"]

    # -- trace-time weight restructuring (folds conv1 im2col + torch flatten) --
    f1 = jnp.arange(F1out)
    W1 = jnp.zeros((3, idim, F1out, odim), jnp.float32)
    for di in range(3):
        for dj in range(3):
            W1 = W1.at[di, 2 * f1 + dj, f1, :].set(
                jnp.broadcast_to(w1[:, 0, di, dj], (F1out, odim)))
    W1 = W1.reshape(3, idim, C1).astype(jnp.bfloat16)
    W2 = jnp.transpose(w2, (2, 3, 1, 0)).reshape(5, 5 * odim, odim)
    W2 = W2.astype(jnp.bfloat16)            # W2[q, dj*odim+ci, co] = w2[co,ci,q,dj]
    WL = jnp.transpose(wl.reshape(odim, odim, F2), (2, 1, 0)).astype(jnp.bfloat16)
    b1row = jnp.tile(b1, F1out).reshape(1, C1).astype(jnp.float32)
    b2row = b2.reshape(1, odim).astype(jnp.float32)
    blrow = bl.reshape(1, odim).astype(jnp.float32)

    # -- input: zero-pad time, 6-phase split, halo-tile (cheap XLA layout) ----
    T_need = 6 * Jtot
    x_pad = jnp.pad(x.astype(jnp.float32), ((0, 0), (0, T_need - T), (0, 0)))
    x_ph = x_pad.reshape(B, Jtot, 6, idim).transpose(0, 2, 1, 3)   # (B,6,Jtot,idim)
    x_tiles = jnp.stack(
        [x_ph[:, :, t2_tile * i: t2_tile * i + J, :] for i in range(n_tiles)],
        axis=1)                                                    # (B,nt,6,J,idim)

    pe = make_positional_encoding(T2_pad, odim)                    # (T2_pad, odim)
    scale = math.sqrt(float(odim))

    kernel = functools.partial(_subsample6_kernel, t2_tile=t2_tile, odim=odim,
                               f2_dim=F2, scale=scale)
    out_full = pl.pallas_call(
        kernel,
        out_shape=jax.ShapeDtypeStruct((B, T2_pad, odim), jnp.float32),
        grid=(B, n_tiles),
        in_specs=[
            pl.BlockSpec((None, None, 6, J, idim), lambda b, i: (b, i, 0, 0, 0)),
            pl.BlockSpec((3, idim, C1), lambda b, i: (0, 0, 0)),
            pl.BlockSpec((5, 5 * odim, odim), lambda b, i: (0, 0, 0)),
            pl.BlockSpec((F2, odim, odim), lambda b, i: (0, 0, 0)),
            pl.BlockSpec((1, C1), lambda b, i: (0, 0)),
            pl.BlockSpec((1, odim), lambda b, i: (0, 0)),
            pl.BlockSpec((1, odim), lambda b, i: (0, 0)),
            pl.BlockSpec((t2_tile, odim), lambda b, i: (i, 0)),    # pe: per time-tile
        ],
        out_specs=pl.BlockSpec((None, t2_tile, odim), lambda b, i: (b, i, 0)),
        compiler_params=pltpu.CompilerParams(
            dimension_semantics=("parallel", "parallel"),
            vmem_limit_bytes=48 * 1024 * 1024,
        ),
    )(x_tiles, W1, W2, WL, b1row, b2row, blrow, pe)

    out = out_full[:, :T2, :]
    if x_mask is None:
        return out, None
    return out, x_mask[:, :, :-2:2][:, :, :-4:3]


# ----------------------------------------------------------------------------
# Pure-JAX reference (f32) for correctness check
# ----------------------------------------------------------------------------
def _reference_forward(x, x_mask, params, odim):
    w1, b1 = params["w1"], params["b1"]
    w2, b2 = params["w2"], params["b2"]
    wl, bl = params["wl"], params["bl"]
    h = x[:, None, :, :]
    h = jax.lax.conv_general_dilated(h, w1, (2, 2), "VALID",
                                     dimension_numbers=("NCHW", "OIHW", "NCHW"))
    h = jax.nn.relu(h + b1[None, :, None, None])
    h = jax.lax.conv_general_dilated(h, w2, (3, 3), "VALID",
                                     dimension_numbers=("NCHW", "OIHW", "NCHW"))
    h = jax.nn.relu(h + b2[None, :, None, None])
    b, c, t, f = h.shape
    flat = jnp.transpose(h, (0, 2, 1, 3)).reshape(b, t, c * f)
    y = flat @ wl.T + bl
    y = y * math.sqrt(float(odim)) + make_positional_encoding(t, odim)[None]
    mask = None if x_mask is None else x_mask[:, :, :-2:2][:, :, :-4:3]
    return y, mask


# ----------------------------------------------------------------------------
# Main
# ----------------------------------------------------------------------------
if __name__ == "__main__":
    B, T, idim, odim = 2, 31, 33, 32
    F2 = ((idim - 1) // 2 - 2) // 3          # Linear input freq dim (= 4 here)

    key = jax.random.PRNGKey(0)
    k = jax.random.split(key, 8)

    x = jax.random.normal(k[0], (B, T, idim), dtype=jnp.float32)
    x_mask = jnp.ones((B, 1, T), dtype=bool)

    params = {
        "w1": 0.1 * jax.random.normal(k[1], (odim, 1, 3, 3), dtype=jnp.float32),
        "b1": 0.1 * jax.random.normal(k[2], (odim,), dtype=jnp.float32),
        "w2": 0.05 * jax.random.normal(k[3], (odim, odim, 5, 5), dtype=jnp.float32),
        "b2": 0.1 * jax.random.normal(k[4], (odim,), dtype=jnp.float32),
        "wl": 0.05 * jax.random.normal(k[5], (odim, odim * F2), dtype=jnp.float32),
        "bl": 0.1 * jax.random.normal(k[6], (odim,), dtype=jnp.float32),
    }

    out, out_mask = conv2d_subsampling6_forward(x, x_mask, params, odim)
    out = jax.block_until_ready(out)
    out_mask = jax.block_until_ready(out_mask)

    ref, ref_mask = _reference_forward(x, x_mask, params, odim)
    ref = jax.block_until_ready(ref)

    assert out.shape == ref.shape
    assert out_mask.shape == (B, 1, out.shape[1])
    assert bool(jnp.all(out_mask == ref_mask))
    max_err = float(jnp.max(jnp.abs(out - ref)))
    # bf16 MXU inputs with f32 accumulation -> small drift vs the f32 reference.
    assert max_err < 0.15, f"max abs error vs reference: {max_err}"

    print("KERNEL_OK")
</pallas_src>

<mosaic_0001>
module attributes {stable_mosaic.version = 11 : i64} {
  func.func @_subsample6_kernel(%arg0: i32, %arg1: i32, %arg2: memref<1x1x6x10x33xf32, #tpu.memory_space<vmem>>, %arg3: memref<3x33x448xbf16, #tpu.memory_space<vmem>>, %arg4: memref<5x160x32xbf16, #tpu.memory_space<vmem>>, %arg5: memref<4x32x32xbf16, #tpu.memory_space<vmem>>, %arg6: memref<1x448xf32, #tpu.memory_space<vmem>>, %arg7: memref<1x32xf32, #tpu.memory_space<vmem>>, %arg8: memref<1x32xf32, #tpu.memory_space<vmem>>, %arg9: memref<8x32xf32, #tpu.memory_space<vmem>>, %arg10: memref<1x8x32xf32, #tpu.memory_space<vmem>>) attributes {dimension_semantics = [#tpu.dimension_semantics<parallel>, #tpu.dimension_semantics<parallel>], iteration_bounds = array<i64: 2, 1>, scalar_prefetch = 0 : i64, scratch_operands = 0 : i64, tpu.core_type = #tpu.core_type<tc>, window_params = [{transform_indices = @transform_0, window_bounds = array<i64: 1, 1, 6, 10, 33>}, {pipeline_mode = #tpu.pipeline_mode<synchronous>, transform_indices = @transform_1, window_bounds = array<i64: 3, 33, 448>}, {pipeline_mode = #tpu.pipeline_mode<synchronous>, transform_indices = @transform_2, window_bounds = array<i64: 5, 160, 32>}, {pipeline_mode = #tpu.pipeline_mode<synchronous>, transform_indices = @transform_3, window_bounds = array<i64: 4, 32, 32>}, {pipeline_mode = #tpu.pipeline_mode<synchronous>, transform_indices = @transform_4, window_bounds = array<i64: 1, 448>}, {pipeline_mode = #tpu.pipeline_mode<synchronous>, transform_indices = @transform_5, window_bounds = array<i64: 1, 32>}, {pipeline_mode = #tpu.pipeline_mode<synchronous>, transform_indices = @transform_6, window_bounds = array<i64: 1, 32>}, {transform_indices = @transform_7, window_bounds = array<i64: 8, 32>}, {transform_indices = @transform_8, window_bounds = array<i64: 1, 8, 32>}]} {
    %c0 = arith.constant 0 : index
    %c0_0 = arith.constant 0 : index
    %c0_1 = arith.constant 0 : index
    %0 = vector.load %arg3[%c0, %c0_0, %c0_1] : memref<3x33x448xbf16, #tpu.memory_space<vmem>>, vector<1x33x448xbf16>
    %1 = vector.shape_cast %0 : vector<1x33x448xbf16> to vector<33x448xbf16>
    %c1 = arith.constant 1 : index
    %c0_2 = arith.constant 0 : index
    %c0_3 = arith.constant 0 : index
    %2 = vector.load %arg3[%c1, %c0_2, %c0_3] : memref<3x33x448xbf16, #tpu.memory_space<vmem>>, vector<1x33x448xbf16>
    %3 = vector.shape_cast %2 : vector<1x33x448xbf16> to vector<33x448xbf16>
    %c2 = arith.constant 2 : index
    %c0_4 = arith.constant 0 : index
    %c0_5 = arith.constant 0 : index
    %4 = vector.load %arg3[%c2, %c0_4, %c0_5] : memref<3x33x448xbf16, #tpu.memory_space<vmem>>, vector<1x33x448xbf16>
    %5 = vector.shape_cast %4 : vector<1x33x448xbf16> to vector<33x448xbf16>
    %c0_6 = arith.constant 0 : index
    %c0_7 = arith.constant 0 : index
    %6 = vector.load %arg6[%c0_6, %c0_7] : memref<1x448xf32, #tpu.memory_space<vmem>>, vector<1x448xf32>
    %c0_8 = arith.constant 0 : index
    %c0_9 = arith.constant 0 : index
    %7 = vector.load %arg7[%c0_8, %c0_9] : memref<1x32xf32, #tpu.memory_space<vmem>>, vector<1x32xf32>
    %c0_10 = arith.constant 0 : index
    %c0_11 = arith.constant 0 : index
    %8 = vector.load %arg8[%c0_10, %c0_11] : memref<1x32xf32, #tpu.memory_space<vmem>>, vector<1x32xf32>
    %cst = arith.constant 0.000000e+00 : f32
    %9 = vector.broadcast %cst : f32 to vector<9x448xf32>
    %c0_12 = arith.constant 0 : index
    %c0_13 = arith.constant 0 : index
    %c0_14 = arith.constant 0 : index
    %c0_15 = arith.constant 0 : index
    %c0_16 = arith.constant 0 : index
    %10 = vector.load %arg2[%c0_12, %c0_13, %c0_14, %c0_15, %c0_16] : memref<1x1x6x10x33xf32, #tpu.memory_space<vmem>>, vector<1x1x1x9x33xf32>
    %11 = vector.shape_cast %10 : vector<1x1x1x9x33xf32> to vector<9x33xf32>
    %12 = arith.truncf %11 : vector<9x33xf32> to vector<9x33xbf16>
    %cst_17 = arith.constant dense<0.000000e+00> : vector<9x448xf32>
    %13 = tpu.matmul %12, %1, %cst_17 {dimension_numbers = #tpu.dot_dimension_numbers<[1], [0], [0], [1], [0, 0, 1, 1], [], []>} : vector<9x33xbf16>, vector<33x448xbf16>, vector<9x448xf32> -> vector<9x448xf32>
    %14 = arith.addf %9, %13 : vector<9x448xf32>
    %c0_18 = arith.constant 0 : index
    %c0_19 = arith.constant 0 : index
    %c1_20 = arith.constant 1 : index
    %c0_21 = arith.constant 0 : index
    %c0_22 = arith.constant 0 : index
    %15 = vector.load %arg2[%c0_18, %c0_19, %c1_20, %c0_21, %c0_22] : memref<1x1x6x10x33xf32, #tpu.memory_space<vmem>>, vector<1x1x1x9x33xf32>
    %16 = vector.shape_cast %15 : vector<1x1x1x9x33xf32> to vector<9x33xf32>
    %17 = arith.truncf %16 : vector<9x33xf32> to vector<9x33xbf16>
    %cst_23 = arith.constant dense<0.000000e+00> : vector<9x448xf32>
    %18 = tpu.matmul %17, %3, %cst_23 {dimension_numbers = #tpu.dot_dimension_numbers<[1], [0], [0], [1], [0, 0, 1, 1], [], []>} : vector<9x33xbf16>, vector<33x448xbf16>, vector<9x448xf32> -> vector<9x448xf32>
    %19 = arith.addf %14, %18 : vector<9x448xf32>
    %c0_24 = arith.constant 0 : index
    %c0_25 = arith.constant 0 : index
    %c2_26 = arith.constant 2 : index
    %c0_27 = arith.constant 0 : index
    %c0_28 = arith.constant 0 : index
    %20 = vector.load %arg2[%c0_24, %c0_25, %c2_26, %c0_27, %c0_28] : memref<1x1x6x10x33xf32, #tpu.memory_space<vmem>>, vector<1x1x1x9x33xf32>
    %21 = vector.shape_cast %20 : vector<1x1x1x9x33xf32> to vector<9x33xf32>
    %22 = arith.truncf %21 : vector<9x33xf32> to vector<9x33xbf16>
    %cst_29 = arith.constant dense<0.000000e+00> : vector<9x448xf32>
    %23 = tpu.matmul %22, %5, %cst_29 {dimension_numbers = #tpu.dot_dimension_numbers<[1], [0], [0], [1], [0, 0, 1, 1], [], []>} : vector<9x33xbf16>, vector<33x448xbf16>, vector<9x448xf32> -> vector<9x448xf32>
    %24 = arith.addf %19, %23 : vector<9x448xf32>
    %25 = vector.broadcast %6 : vector<1x448xf32> to vector<9x448xf32>
    %26 = arith.addf %24, %25 : vector<9x448xf32>
    %cst_30 = arith.constant 0.000000e+00 : f32
    %27 = vector.broadcast %cst_30 : f32 to vector<9x448xf32>
    %28 = arith.maximumf %26, %27 : vector<9x448xf32>
    %cst_31 = arith.constant 0.000000e+00 : f32
    %29 = vector.broadcast %cst_31 : f32 to vector<9x448xf32>
    %c0_32 = arith.constant 0 : index
    %c0_33 = arith.constant 0 : index
    %c2_34 = arith.constant 2 : index
    %c0_35 = arith.constant 0 : index
    %c0_36 = arith.constant 0 : index
    %30 = vector.load %arg2[%c0_32, %c0_33, %c2_34, %c0_35, %c0_36] : memref<1x1x6x10x33xf32, #tpu.memory_space<vmem>>, vector<1x1x1x9x33xf32>
    %31 = vector.shape_cast %30 : vector<1x1x1x9x33xf32> to vector<9x33xf32>
    %32 = arith.truncf %31 : vector<9x33xf32> to vector<9x33xbf16>
    %cst_37 = arith.constant dense<0.000000e+00> : vector<9x448xf32>
    %33 = tpu.matmul %32, %1, %cst_37 {dimension_numbers = #tpu.dot_dimension_numbers<[1], [0], [0], [1], [0, 0, 1, 1], [], []>} : vector<9x33xbf16>, vector<33x448xbf16>, vector<9x448xf32> -> vector<9x448xf32>
    %34 = arith.addf %29, %33 : vector<9x448xf32>
    %c0_38 = arith.constant 0 : index
    %c0_39 = arith.constant 0 : index
    %c3 = arith.constant 3 : index
    %c0_40 = arith.constant 0 : index
    %c0_41 = arith.constant 0 : index
    %35 = vector.load %arg2[%c0_38, %c0_39, %c3, %c0_40, %c0_41] : memref<1x1x6x10x33xf32, #tpu.memory_space<vmem>>, vector<1x1x1x9x33xf32>
    %36 = vector.shape_cast %35 : vector<1x1x1x9x33xf32> to vector<9x33xf32>
    %37 = arith.truncf %36 : vector<9x33xf32> to vector<9x33xbf16>
    %cst_42 = arith.constant dense<0.000000e+00> : vector<9x448xf32>
    %38 = tpu.matmul %37, %3, %cst_42 {dimension_numbers = #tpu.dot_dimension_numbers<[1], [0], [0], [1], [0, 0, 1, 1], [], []>} : vector<9x33xbf16>, vector<33x448xbf16>, vector<9x448xf32> -> vector<9x448xf32>
    %39 = arith.addf %34, %38 : vector<9x448xf32>
    %c0_43 = arith.constant 0 : index
    %c0_44 = arith.constant 0 : index
    %c4 = arith.constant 4 : index
    %c0_45 = arith.constant 0 : index
    %c0_46 = arith.constant 0 : index
    %40 = vector.load %arg2[%c0_43, %c0_44, %c4, %c0_45, %c0_46] : memref<1x1x6x10x33xf32, #tpu.memory_space<vmem>>, vector<1x1x1x9x33xf32>
    %41 = vector.shape_cast %40 : vector<1x1x1x9x33xf32> to vector<9x33xf32>
    %42 = arith.truncf %41 : vector<9x33xf32> to vector<9x33xbf16>
    %cst_47 = arith.constant dense<0.000000e+00> : vector<9x448xf32>
    %43 = tpu.matmul %42, %5, %cst_47 {dimension_numbers = #tpu.dot_dimension_numbers<[1], [0], [0], [1], [0, 0, 1, 1], [], []>} : vector<9x33xbf16>, vector<33x448xbf16>, vector<9x448xf32> -> vector<9x448xf32>
    %44 = arith.addf %39, %43 : vector<9x448xf32>
    %45 = vector.broadcast %6 : vector<1x448xf32> to vector<9x448xf32>
    %46 = arith.addf %44, %45 : vector<9x448xf32>
    %cst_48 = arith.constant 0.000000e+00 : f32
    %47 = vector.broadcast %cst_48 : f32 to vector<9x448xf32>
    %48 = arith.maximumf %46, %47 : vector<9x448xf32>
    %cst_49 = arith.constant 0.000000e+00 : f32
    %49 = vector.broadcast %cst_49 : f32 to vector<9x448xf32>
    %c0_50 = arith.constant 0 : index
    %c0_51 = arith.constant 0 : index
    %c4_52 = arith.constant 4 : index
    %c0_53 = arith.constant 0 : index
    %c0_54 = arith.constant 0 : index
    %50 = vector.load %arg2[%c0_50, %c0_51, %c4_52, %c0_53, %c0_54] : memref<1x1x6x10x33xf32, #tpu.memory_space<vmem>>, vector<1x1x1x9x33xf32>
    %51 = vector.shape_cast %50 : vector<1x1x1x9x33xf32> to vector<9x33xf32>
    %52 = arith.truncf %51 : vector<9x33xf32> to vector<9x33xbf16>
    %cst_55 = arith.constant dense<0.000000e+00> : vector<9x448xf32>
    %53 = tpu.matmul %52, %1, %cst_55 {dimension_numbers = #tpu.dot_dimension_numbers<[1], [0], [0], [1], [0, 0, 1, 1], [], []>} : vector<9x33xbf16>, vector<33x448xbf16>, vector<9x448xf32> -> vector<9x448xf32>
    %54 = arith.addf %49, %53 : vector<9x448xf32>
    %c0_56 = arith.constant 0 : index
    %c0_57 = arith.constant 0 : index
    %c5 = arith.constant 5 : index
    %c0_58 = arith.constant 0 : index
    %c0_59 = arith.constant 0 : index
    %55 = vector.load %arg2[%c0_56, %c0_57, %c5, %c0_58, %c0_59] : memref<1x1x6x10x33xf32, #tpu.memory_space<vmem>>, vector<1x1x1x9x33xf32>
    %56 = vector.shape_cast %55 : vector<1x1x1x9x33xf32> to vector<9x33xf32>
    %57 = arith.truncf %56 : vector<9x33xf32> to vector<9x33xbf16>
    %cst_60 = arith.constant dense<0.000000e+00> : vector<9x448xf32>
    %58 = tpu.matmul %57, %3, %cst_60 {dimension_numbers = #tpu.dot_dimension_numbers<[1], [0], [0], [1], [0, 0, 1, 1], [], []>} : vector<9x33xbf16>, vector<33x448xbf16>, vector<9x448xf32> -> vector<9x448xf32>
    %59 = arith.addf %54, %58 : vector<9x448xf32>
    %c0_61 = arith.constant 0 : index
    %c0_62 = arith.constant 0 : index
    %c0_63 = arith.constant 0 : index
    %c1_64 = arith.constant 1 : index
    %c0_65 = arith.constant 0 : index
    %60 = vector.load %arg2[%c0_61, %c0_62, %c0_63, %c1_64, %c0_65] : memref<1x1x6x10x33xf32, #tpu.memory_space<vmem>>, vector<1x1x1x9x33xf32>
    %61 = vector.shape_cast %60 : vector<1x1x1x9x33xf32> to vector<9x33xf32>
    %62 = arith.truncf %61 : vector<9x33xf32> to vector<9x33xbf16>
    %cst_66 = arith.constant dense<0.000000e+00> : vector<9x448xf32>
    %63 = tpu.matmul %62, %5, %cst_66 {dimension_numbers = #tpu.dot_dimension_numbers<[1], [0], [0], [1], [0, 0, 1, 1], [], []>} : vector<9x33xbf16>, vector<33x448xbf16>, vector<9x448xf32> -> vector<9x448xf32>
    %64 = arith.addf %59, %63 : vector<9x448xf32>
    %65 = vector.broadcast %6 : vector<1x448xf32> to vector<9x448xf32>
    %66 = arith.addf %64, %65 : vector<9x448xf32>
    %cst_67 = arith.constant 0.000000e+00 : f32
    %67 = vector.broadcast %cst_67 : f32 to vector<9x448xf32>
    %68 = arith.maximumf %66, %67 : vector<9x448xf32>
    %cst_68 = arith.constant 0.000000e+00 : f32
    %69 = vector.broadcast %cst_68 : f32 to vector<8x32xf32>
    %cst_69 = arith.constant 0.000000e+00 : f32
    %70 = vector.broadcast %cst_69 : f32 to vector<8x32xf32>
    %cst_70 = arith.constant 0.000000e+00 : f32
    %71 = vector.broadcast %cst_70 : f32 to vector<8x32xf32>
    %cst_71 = arith.constant 0.000000e+00 : f32
    %72 = vector.broadcast %cst_71 : f32 to vector<8x32xf32>
    %73 = vector.extract_strided_slice %28 {offsets = [0, 0], sizes = [8, 448], strides = [1, 1]} : vector<9x448xf32> to vector<8x448xf32>
    %c0_72 = arith.constant 0 : index
    %c0_73 = arith.constant 0 : index
    %c0_74 = arith.constant 0 : index
    %74 = vector.load %arg4[%c0_72, %c0_73, %c0_74] : memref<5x160x32xbf16, #tpu.memory_space<vmem>>, vector<1x160x32xbf16>
    %75 = vector.shape_cast %74 : vector<1x160x32xbf16> to vector<160x32xbf16>
    %76 = vector.extract_strided_slice %73 {offsets = [0, 0], sizes = [8, 160], strides = [1, 1]} : vector<8x448xf32> to vector<8x160xf32>
    %77 = arith.truncf %76 : vector<8x160xf32> to vector<8x160xbf16>
    %cst_75 = arith.constant dense<0.000000e+00> : vector<8x32xf32>
    %78 = tpu.matmul %77, %75, %cst_75 {dimension_numbers = #tpu.dot_dimension_numbers<[1], [0], [0], [1], [0, 0, 1, 1], [], []>} : vector<8x160xbf16>, vector<160x32xbf16>, vector<8x32xf32> -> vector<8x32xf32>
    %79 = arith.addf %69, %78 : vector<8x32xf32>
    %80 = vector.extract_strided_slice %73 {offsets = [0, 96], sizes = [8, 160], strides = [1, 1]} : vector<8x448xf32> to vector<8x160xf32>
    %81 = arith.truncf %80 : vector<8x160xf32> to vector<8x160xbf16>
    %cst_76 = arith.constant dense<0.000000e+00> : vector<8x32xf32>
    %82 = tpu.matmul %81, %75, %cst_76 {dimension_numbers = #tpu.dot_dimension_numbers<[1], [0], [0], [1], [0, 0, 1, 1], [], []>} : vector<8x160xbf16>, vector<160x32xbf16>, vector<8x32xf32> -> vector<8x32xf32>
    %83 = arith.addf %70, %82 : vector<8x32xf32>
    %84 = vector.extract_strided_slice %73 {offsets = [0, 192], sizes = [8, 160], strides = [1, 1]} : vector<8x448xf32> to vector<8x160xf32>
    %85 = arith.truncf %84 : vector<8x160xf32> to vector<8x160xbf16>
    %cst_77 = arith.constant dense<0.000000e+00> : vector<8x32xf32>
    %86 = tpu.matmul %85, %75, %cst_77 {dimension_numbers = #tpu.dot_dimension_numbers<[1], [0], [0], [1], [0, 0, 1, 1], [], []>} : vector<8x160xbf16>, vector<160x32xbf16>, vector<8x32xf32> -> vector<8x32xf32>
    %87 = arith.addf %71, %86 : vector<8x32xf32>
    %88 = vector.extract_strided_slice %73 {offsets = [0, 288], sizes = [8, 160], strides = [1, 1]} : vector<8x448xf32> to vector<8x160xf32>
    %89 = arith.truncf %88 : vector<8x160xf32> to vector<8x160xbf16>
    %cst_78 = arith.constant dense<0.000000e+00> : vector<8x32xf32>
    %90 = tpu.matmul %89, %75, %cst_78 {dimension_numbers = #tpu.dot_dimension_numbers<[1], [0], [0], [1], [0, 0, 1, 1], [], []>} : vector<8x160xbf16>, vector<160x32xbf16>, vector<8x32xf32> -> vector<8x32xf32>
    %91 = arith.addf %72, %90 : vector<8x32xf32>
    %92 = vector.extract_strided_slice %48 {offsets = [0, 0], sizes = [8, 448], strides = [1, 1]} : vector<9x448xf32> to vector<8x448xf32>
    %c1_79 = arith.constant 1 : index
    %c0_80 = arith.constant 0 : index
    %c0_81 = arith.constant 0 : index
    %93 = vector.load %arg4[%c1_79, %c0_80, %c0_81] : memref<5x160x32xbf16, #tpu.memory_space<vmem>>, vector<1x160x32xbf16>
    %94 = vector.shape_cast %93 : vector<1x160x32xbf16> to vector<160x32xbf16>
    %95 = vector.extract_strided_slice %92 {offsets = [0, 0], sizes = [8, 160], strides = [1, 1]} : vector<8x448xf32> to vector<8x160xf32>
    %96 = arith.truncf %95 : vector<8x160xf32> to vector<8x160xbf16>
    %cst_82 = arith.constant dense<0.000000e+00> : vector<8x32xf32>
    %97 = tpu.matmul %96, %94, %cst_82 {dimension_numbers = #tpu.dot_dimension_numbers<[1], [0], [0], [1], [0, 0, 1, 1], [], []>} : vector<8x160xbf16>, vector<160x32xbf16>, vector<8x32xf32> -> vector<8x32xf32>
    %98 = arith.addf %79, %97 : vector<8x32xf32>
    %99 = vector.extract_strided_slice %92 {offsets = [0, 96], sizes = [8, 160], strides = [1, 1]} : vector<8x448xf32> to vector<8x160xf32>
    %100 = arith.truncf %99 : vector<8x160xf32> to vector<8x160xbf16>
    %cst_83 = arith.constant dense<0.000000e+00> : vector<8x32xf32>
    %101 = tpu.matmul %100, %94, %cst_83 {dimension_numbers = #tpu.dot_dimension_numbers<[1], [0], [0], [1], [0, 0, 1, 1], [], []>} : vector<8x160xbf16>, vector<160x32xbf16>, vector<8x32xf32> -> vector<8x32xf32>
    %102 = arith.addf %83, %101 : vector<8x32xf32>
    %103 = vector.extract_strided_slice %92 {offsets = [0, 192], sizes = [8, 160], strides = [1, 1]} : vector<8x448xf32> to vector<8x160xf32>
    %104 = arith.truncf %103 : vector<8x160xf32> to vector<8x160xbf16>
    %cst_84 = arith.constant dense<0.000000e+00> : vector<8x32xf32>
    %105 = tpu.matmul %104, %94, %cst_84 {dimension_numbers = #tpu.dot_dimension_numbers<[1], [0], [0], [1], [0, 0, 1, 1], [], []>} : vector<8x160xbf16>, vector<160x32xbf16>, vector<8x32xf32> -> vector<8x32xf32>
    %106 = arith.addf %87, %105 : vector<8x32xf32>
    %107 = vector.extract_strided_slice %92 {offsets = [0, 288], sizes = [8, 160], strides = [1, 1]} : vector<8x448xf32> to vector<8x160xf32>
    %108 = arith.truncf %107 : vector<8x160xf32> to vector<8x160xbf16>
    %cst_85 = arith.constant dense<0.000000e+00> : vector<8x32xf32>
    %109 = tpu.matmul %108, %94, %cst_85 {dimension_numbers = #tpu.dot_dimension_numbers<[1], [0], [0], [1], [0, 0, 1, 1], [], []>} : vector<8x160xbf16>, vector<160x32xbf16>, vector<8x32xf32> -> vector<8x32xf32>
    %110 = arith.addf %91, %109 : vector<8x32xf32>
    %111 = vector.extract_strided_slice %68 {offsets = [0, 0], sizes = [8, 448], strides = [1, 1]} : vector<9x448xf32> to vector<8x448xf32>
    %c2_86 = arith.constant 2 : index
    %c0_87 = arith.constant 0 : index
    %c0_88 = arith.constant 0 : index
    %112 = vector.load %arg4[%c2_86, %c0_87, %c0_88] : memref<5x160x32xbf16, #tpu.memory_space<vmem>>, vector<1x160x32xbf16>
    %113 = vector.shape_cast %112 : vector<1x160x32xbf16> to vector<160x32xbf16>
    %114 = vector.extract_strided_slice %111 {offsets = [0, 0], sizes = [8, 160], strides = [1, 1]} : vector<8x448xf32> to vector<8x160xf32>
    %115 = arith.truncf %114 : vector<8x160xf32> to vector<8x160xbf16>
    %cst_89 = arith.constant dense<0.000000e+00> : vector<8x32xf32>
    %116 = tpu.matmul %115, %113, %cst_89 {dimension_numbers = #tpu.dot_dimension_numbers<[1], [0], [0], [1], [0, 0, 1, 1], [], []>} : vector<8x160xbf16>, vector<160x32xbf16>, vector<8x32xf32> -> vector<8x32xf32>
    %117 = arith.addf %98, %116 : vector<8x32xf32>
    %118 = vector.extract_strided_slice %111 {offsets = [0, 96], sizes = [8, 160], strides = [1, 1]} : vector<8x448xf32> to vector<8x160xf32>
    %119 = arith.truncf %118 : vector<8x160xf32> to vector<8x160xbf16>
    %cst_90 = arith.constant dense<0.000000e+00> : vector<8x32xf32>
    %120 = tpu.matmul %119, %113, %cst_90 {dimension_numbers = #tpu.dot_dimension_numbers<[1], [0], [0], [1], [0, 0, 1, 1], [], []>} : vector<8x160xbf16>, vector<160x32xbf16>, vector<8x32xf32> -> vector<8x32xf32>
    %121 = arith.addf %102, %120 : vector<8x32xf32>
    %122 = vector.extract_strided_slice %111 {offsets = [0, 192], sizes = [8, 160], strides = [1, 1]} : vector<8x448xf32> to vector<8x160xf32>
    %123 = arith.truncf %122 : vector<8x160xf32> to vector<8x160xbf16>
    %cst_91 = arith.constant dense<0.000000e+00> : vector<8x32xf32>
    %124 = tpu.matmul %123, %113, %cst_91 {dimension_numbers = #tpu.dot_dimension_numbers<[1], [0], [0], [1], [0, 0, 1, 1], [], []>} : vector<8x160xbf16>, vector<160x32xbf16>, vector<8x32xf32> -> vector<8x32xf32>
    %125 = arith.addf %106, %124 : vector<8x32xf32>
    %126 = vector.extract_strided_slice %111 {offsets = [0, 288], sizes = [8, 160], strides = [1, 1]} : vector<8x448xf32> to vector<8x160xf32>
    %127 = arith.truncf %126 : vector<8x160xf32> to vector<8x160xbf16>
    %cst_92 = arith.constant dense<0.000000e+00> : vector<8x32xf32>
    %128 = tpu.matmul %127, %113, %cst_92 {dimension_numbers = #tpu.dot_dimension_numbers<[1], [0], [0], [1], [0, 0, 1, 1], [], []>} : vector<8x160xbf16>, vector<160x32xbf16>, vector<8x32xf32> -> vector<8x32xf32>
    %129 = arith.addf %110, %128 : vector<8x32xf32>
    %130 = vector.extract_strided_slice %28 {offsets = [1, 0], sizes = [8, 448], strides = [1, 1]} : vector<9x448xf32> to vector<8x448xf32>
    %c3_93 = arith.constant 3 : index
    %c0_94 = arith.constant 0 : index
    %c0_95 = arith.constant 0 : index
    %131 = vector.load %arg4[%c3_93, %c0_94, %c0_95] : memref<5x160x32xbf16, #tpu.memory_space<vmem>>, vector<1x160x32xbf16>
    %132 = vector.shape_cast %131 : vector<1x160x32xbf16> to vector<160x32xbf16>
    %133 = vector.extract_strided_slice %130 {offsets = [0, 0], sizes = [8, 160], strides = [1, 1]} : vector<8x448xf32> to vector<8x160xf32>
    %134 = arith.truncf %133 : vector<8x160xf32> to vector<8x160xbf16>
    %cst_96 = arith.constant dense<0.000000e+00> : vector<8x32xf32>
    %135 = tpu.matmul %134, %132, %cst_96 {dimension_numbers = #tpu.dot_dimension_numbers<[1], [0], [0], [1], [0, 0, 1, 1], [], []>} : vector<8x160xbf16>, vector<160x32xbf16>, vector<8x32xf32> -> vector<8x32xf32>
    %136 = arith.addf %117, %135 : vector<8x32xf32>
    %137 = vector.extract_strided_slice %130 {offsets = [0, 96], sizes = [8, 160], strides = [1, 1]} : vector<8x448xf32> to vector<8x160xf32>
    %138 = arith.truncf %137 : vector<8x160xf32> to vector<8x160xbf16>
    %cst_97 = arith.constant dense<0.000000e+00> : vector<8x32xf32>
    %139 = tpu.matmul %138, %132, %cst_97 {dimension_numbers = #tpu.dot_dimension_numbers<[1], [0], [0], [1], [0, 0, 1, 1], [], []>} : vector<8x160xbf16>, vector<160x32xbf16>, vector<8x32xf32> -> vector<8x32xf32>
    %140 = arith.addf %121, %139 : vector<8x32xf32>
    %141 = vector.extract_strided_slice %130 {offsets = [0, 192], sizes = [8, 160], strides = [1, 1]} : vector<8x448xf32> to vector<8x160xf32>
    %142 = arith.truncf %141 : vector<8x160xf32> to vector<8x160xbf16>
    %cst_98 = arith.constant dense<0.000000e+00> : vector<8x32xf32>
    %143 = tpu.matmul %142, %132, %cst_98 {dimension_numbers = #tpu.dot_dimension_numbers<[1], [0], [0], [1], [0, 0, 1, 1], [], []>} : vector<8x160xbf16>, vector<160x32xbf16>, vector<8x32xf32> -> vector<8x32xf32>
    %144 = arith.addf %125, %143 : vector<8x32xf32>
    %145 = vector.extract_strided_slice %130 {offsets = [0, 288], sizes = [8, 160], strides = [1, 1]} : vector<8x448xf32> to vector<8x160xf32>
    %146 = arith.truncf %145 : vector<8x160xf32> to vector<8x160xbf16>
    %cst_99 = arith.constant dense<0.000000e+00> : vector<8x32xf32>
    %147 = tpu.matmul %146, %132, %cst_99 {dimension_numbers = #tpu.dot_dimension_numbers<[1], [0], [0], [1], [0, 0, 1, 1], [], []>} : vector<8x160xbf16>, vector<160x32xbf16>, vector<8x32xf32> -> vector<8x32xf32>
    %148 = arith.addf %129, %147 : vector<8x32xf32>
    %149 = vector.extract_strided_slice %48 {offsets = [1, 0], sizes = [8, 448], strides = [1, 1]} : vector<9x448xf32> to vector<8x448xf32>
    %c4_100 = arith.constant 4 : index
    %c0_101 = arith.constant 0 : index
    %c0_102 = arith.constant 0 : index
    %150 = vector.load %arg4[%c4_100, %c0_101, %c0_102] : memref<5x160x32xbf16, #tpu.memory_space<vmem>>, vector<1x160x32xbf16>
    %151 = vector.shape_cast %150 : vector<1x160x32xbf16> to vector<160x32xbf16>
    %152 = vector.extract_strided_slice %149 {offsets = [0, 0], sizes = [8, 160], strides = [1, 1]} : vector<8x448xf32> to vector<8x160xf32>
    %153 = arith.truncf %152 : vector<8x160xf32> to vector<8x160xbf16>
    %cst_103 = arith.constant dense<0.000000e+00> : vector<8x32xf32>
    %154 = tpu.matmul %153, %151, %cst_103 {dimension_numbers = #tpu.dot_dimension_numbers<[1], [0], [0], [1], [0, 0, 1, 1], [], []>} : vector<8x160xbf16>, vector<160x32xbf16>, vector<8x32xf32> -> vector<8x32xf32>
    %155 = arith.addf %136, %154 : vector<8x32xf32>
    %156 = vector.extract_strided_slice %149 {offsets = [0, 96], sizes = [8, 160], strides = [1, 1]} : vector<8x448xf32> to vector<8x160xf32>
    %157 = arith.truncf %156 : vector<8x160xf32> to vector<8x160xbf16>
    %cst_104 = arith.constant dense<0.000000e+00> : vector<8x32xf32>
    %158 = tpu.matmul %157, %151, %cst_104 {dimension_numbers = #tpu.dot_dimension_numbers<[1], [0], [0], [1], [0, 0, 1, 1], [], []>} : vector<8x160xbf16>, vector<160x32xbf16>, vector<8x32xf32> -> vector<8x32xf32>
    %159 = arith.addf %140, %158 : vector<8x32xf32>
    %160 = vector.extract_strided_slice %149 {offsets = [0, 192], sizes = [8, 160], strides = [1, 1]} : vector<8x448xf32> to vector<8x160xf32>
    %161 = arith.truncf %160 : vector<8x160xf32> to vector<8x160xbf16>
    %cst_105 = arith.constant dense<0.000000e+00> : vector<8x32xf32>
    %162 = tpu.matmul %161, %151, %cst_105 {dimension_numbers = #tpu.dot_dimension_numbers<[1], [0], [0], [1], [0, 0, 1, 1], [], []>} : vector<8x160xbf16>, vector<160x32xbf16>, vector<8x32xf32> -> vector<8x32xf32>
    %163 = arith.addf %144, %162 : vector<8x32xf32>
    %164 = vector.extract_strided_slice %149 {offsets = [0, 288], sizes = [8, 160], strides = [1, 1]} : vector<8x448xf32> to vector<8x160xf32>
    %165 = arith.truncf %164 : vector<8x160xf32> to vector<8x160xbf16>
    %cst_106 = arith.constant dense<0.000000e+00> : vector<8x32xf32>
    %166 = tpu.matmul %165, %151, %cst_106 {dimension_numbers = #tpu.dot_dimension_numbers<[1], [0], [0], [1], [0, 0, 1, 1], [], []>} : vector<8x160xbf16>, vector<160x32xbf16>, vector<8x32xf32> -> vector<8x32xf32>
    %167 = arith.addf %148, %166 : vector<8x32xf32>
    %cst_107 = arith.constant 0.000000e+00 : f32
    %168 = vector.broadcast %cst_107 : f32 to vector<8x32xf32>
    %169 = vector.broadcast %7 : vector<1x32xf32> to vector<8x32xf32>
    %170 = arith.addf %155, %169 : vector<8x32xf32>
    %cst_108 = arith.constant 0.000000e+00 : f32
    %171 = vector.broadcast %cst_108 : f32 to vector<8x32xf32>
    %172 = arith.maximumf %170, %171 : vector<8x32xf32>
    %173 = arith.truncf %172 : vector<8x32xf32> to vector<8x32xbf16>
    %c0_109 = arith.constant 0 : index
    %c0_110 = arith.constant 0 : index
    %c0_111 = arith.constant 0 : index
    %174 = vector.load %arg5[%c0_109, %c0_110, %c0_111] : memref<4x32x32xbf16, #tpu.memory_space<vmem>>, vector<1x32x32xbf16>
    %175 = vector.shape_cast %174 : vector<1x32x32xbf16> to vector<32x32xbf16>
    %cst_112 = arith.constant dense<0.000000e+00> : vector<8x32xf32>
    %176 = tpu.matmul %173, %175, %cst_112 {dimension_numbers = #tpu.dot_dimension_numbers<[1], [0], [0], [1], [0, 0, 1, 1], [], []>} : vector<8x32xbf16>, vector<32x32xbf16>, vector<8x32xf32> -> vector<8x32xf32>
    %177 = arith.addf %168, %176 : vector<8x32xf32>
    %178 = vector.broadcast %7 : vector<1x32xf32> to vector<8x32xf32>
    %179 = arith.addf %159, %178 : vector<8x32xf32>
    %cst_113 = arith.constant 0.000000e+00 : f32
    %180 = vector.broadcast %cst_113 : f32 to vector<8x32xf32>
    %181 = arith.maximumf %179, %180 : vector<8x32xf32>
    %182 = arith.truncf %181 : vector<8x32xf32> to vector<8x32xbf16>
    %c1_114 = arith.constant 1 : index
    %c0_115 = arith.constant 0 : index
    %c0_116 = arith.constant 0 : index
    %183 = vector.load %arg5[%c1_114, %c0_115, %c0_116] : memref<4x32x32xbf16, #tpu.memory_space<vmem>>, vector<1x32x32xbf16>
    %184 = vector.shape_cast %183 : vector<1x32x32xbf16> to vector<32x32xbf16>
    %cst_117 = arith.constant dense<0.000000e+00> : vector<8x32xf32>
    %185 = tpu.matmul %182, %184, %cst_117 {dimension_numbers = #tpu.dot_dimension_numbers<[1], [0], [0], [1], [0, 0, 1, 1], [], []>} : vector<8x32xbf16>, vector<32x32xbf16>, vector<8x32xf32> -> vector<8x32xf32>
    %186 = arith.addf %177, %185 : vector<8x32xf32>
    %187 = vector.broadcast %7 : vector<1x32xf32> to vector<8x32xf32>
    %188 = arith.addf %163, %187 : vector<8x32xf32>
    %cst_118 = arith.constant 0.000000e+00 : f32
    %189 = vector.broadcast %cst_118 : f32 to vector<8x32xf32>
    %190 = arith.maximumf %188, %189 : vector<8x32xf32>
    %191 = arith.truncf %190 : vector<8x32xf32> to vector<8x32xbf16>
    %c2_119 = arith.constant 2 : index
    %c0_120 = arith.constant 0 : index
    %c0_121 = arith.constant 0 : index
    %192 = vector.load %arg5[%c2_119, %c0_120, %c0_121] : memref<4x32x32xbf16, #tpu.memory_space<vmem>>, vector<1x32x32xbf16>
    %193 = vector.shape_cast %192 : vector<1x32x32xbf16> to vector<32x32xbf16>
    %cst_122 = arith.constant dense<0.000000e+00> : vector<8x32xf32>
    %194 = tpu.matmul %191, %193, %cst_122 {dimension_numbers = #tpu.dot_dimension_numbers<[1], [0], [0], [1], [0, 0, 1, 1], [], []>} : vector<8x32xbf16>, vector<32x32xbf16>, vector<8x32xf32> -> vector<8x32xf32>
    %195 = arith.addf %186, %194 : vector<8x32xf32>
    %196 = vector.broadcast %7 : vector<1x32xf32> to vector<8x32xf32>
    %197 = arith.addf %167, %196 : vector<8x32xf32>
    %cst_123 = arith.constant 0.000000e+00 : f32
    %198 = vector.broadcast %cst_123 : f32 to vector<8x32xf32>
    %199 = arith.maximumf %197, %198 : vector<8x32xf32>
    %200 = arith.truncf %199 : vector<8x32xf32> to vector<8x32xbf16>
    %c3_124 = arith.constant 3 : index
    %c0_125 = arith.constant 0 : index
    %c0_126 = arith.constant 0 : index
    %201 = vector.load %arg5[%c3_124, %c0_125, %c0_126] : memref<4x32x32xbf16, #tpu.memory_space<vmem>>, vector<1x32x32xbf16>
    %202 = vector.shape_cast %201 : vector<1x32x32xbf16> to vector<32x32xbf16>
    %cst_127 = arith.constant dense<0.000000e+00> : vector<8x32xf32>
    %203 = tpu.matmul %200, %202, %cst_127 {dimension_numbers = #tpu.dot_dimension_numbers<[1], [0], [0], [1], [0, 0, 1, 1], [], []>} : vector<8x32xbf16>, vector<32x32xbf16>, vector<8x32xf32> -> vector<8x32xf32>
    %204 = arith.addf %195, %203 : vector<8x32xf32>
    %205 = vector.broadcast %8 : vector<1x32xf32> to vector<8x32xf32>
    %206 = arith.addf %204, %205 : vector<8x32xf32>
    %cst_128 = arith.constant 5.65685415 : f32
    %207 = vector.broadcast %cst_128 : f32 to vector<8x32xf32>
    %208 = arith.mulf %206, %207 : vector<8x32xf32>
    %c0_129 = arith.constant 0 : index
    %c0_130 = arith.constant 0 : index
    %209 = vector.load %arg9[%c0_129, %c0_130] : memref<8x32xf32, #tpu.memory_space<vmem>>, vector<8x32xf32>
    %210 = arith.addf %208, %209 : vector<8x32xf32>
    %c0_131 = arith.constant 0 : index
    %c0_132 = arith.constant 0 : index
    %c0_133 = arith.constant 0 : index
    %211 = vector.load %arg10[%c0_131, %c0_132, %c0_133] : memref<1x8x32xf32, #tpu.memory_space<vmem>>, vector<1x8x32xf32>
    %212 = vector.shape_cast %211 : vector<1x8x32xf32> to vector<8x32xf32>
    %213 = vector.shape_cast %210 : vector<8x32xf32> to vector<1x8x32xf32>
    tpu.vector_store %arg10[%c0_131, %c0_132, %c0_133], %213 {strides = array<i32>} : memref<1x8x32xf32, #tpu.memory_space<vmem>>, vector<1x8x32xf32>,
    return
  }
  func.func @transform_0(%arg0: i32, %arg1: i32) -> (i32, i32, i32, i32, i32) {
    %c0_i32 = arith.constant 0 : i32
    %c0_i32_0 = arith.constant 0 : i32
    %c0_i32_1 = arith.constant 0 : i32
    %c0_i32_2 = arith.constant 0 : i32
    return %arg0, %arg1, %c0_i32, %c0_i32_0, %c0_i32_1 : i32, i32, i32, i32, i32
  }
  func.func @transform_1(%arg0: i32, %arg1: i32) -> (i32, i32, i32) {
    %c0_i32 = arith.constant 0 : i32
    %c0_i32_0 = arith.constant 0 : i32
    %c0_i32_1 = arith.constant 0 : i32
    %c0_i32_2 = arith.constant 0 : i32
    return %c0_i32, %c0_i32_0, %c0_i32_1 : i32, i32, i32
  }
  func.func @transform_2(%arg0: i32, %arg1: i32) -> (i32, i32, i32) {
    %c0_i32 = arith.constant 0 : i32
    %c0_i32_0 = arith.constant 0 : i32
    %c0_i32_1 = arith.constant 0 : i32
    %c0_i32_2 = arith.constant 0 : i32
    return %c0_i32, %c0_i32_0, %c0_i32_1 : i32, i32, i32
  }
  func.func @transform_3(%arg0: i32, %arg1: i32) -> (i32, i32, i32) {
    %c0_i32 = arith.constant 0 : i32
    %c0_i32_0 = arith.constant 0 : i32
    %c0_i32_1 = arith.constant 0 : i32
    %c0_i32_2 = arith.constant 0 : i32
    return %c0_i32, %c0_i32_0, %c0_i32_1 : i32, i32, i32
  }
  func.func @transform_4(%arg0: i32, %arg1: i32) -> (i32, i32) {
    %c0_i32 = arith.constant 0 : i32
    %c0_i32_0 = arith.constant 0 : i32
    %c0_i32_1 = arith.constant 0 : i32
    return %c0_i32, %c0_i32_0 : i32, i32
  }
  func.func @transform_5(%arg0: i32, %arg1: i32) -> (i32, i32) {
    %c0_i32 = arith.constant 0 : i32
    %c0_i32_0 = arith.constant 0 : i32
    %c0_i32_1 = arith.constant 0 : i32
    return %c0_i32, %c0_i32_0 : i32, i32
  }
  func.func @transform_6(%arg0: i32, %arg1: i32) -> (i32, i32) {
    %c0_i32 = arith.constant 0 : i32
    %c0_i32_0 = arith.constant 0 : i32
    %c0_i32_1 = arith.constant 0 : i32
    return %c0_i32, %c0_i32_0 : i32, i32
  }
  func.func @transform_7(%arg0: i32, %arg1: i32) -> (i32, i32) {
    %c0_i32 = arith.constant 0 : i32
    %c0_i32_0 = arith.constant 0 : i32
    return %arg1, %c0_i32 : i32, i32
  }
  func.func @transform_8(%arg0: i32, %arg1: i32) -> (i32, i32, i32) {
    %c0_i32 = arith.constant 0 : i32
    %c0_i32_0 = arith.constant 0 : i32
    return %arg0, %arg1, %c0_i32 : i32, i32, i32
  }
}

</mosaic_0001>

<bundles_post_ra>
// kernel: tpu_custom_call.1
= control target key start
LH: loop header
LB: loop body
LE: loop exit
PB: predicated region body
PF: predicated region fallthrough
CT: control target
= control target key end

     0   :  { %13 = vsyncpa [#allocation3], 0  ;;  %s5332_s0 = inlined_call_operand.vmem [shape: f32[2,1,6,10,33], index: 0, kind: input, shape index: {}]   ;;  %s5333_s1 = inlined_call_operand.vmem [shape: bf16[3,33,448], index: 1, kind: input, shape index: {}]   ;;  %s5334_s2 = inlined_call_operand.vmem [shape: bf16[5,160,32], index: 2, kind: input, shape index: {}]   ;;  %s5335_s3 = inlined_call_operand.vmem [shape: bf16[4,32,32], index: 3, kind: input, shape index: {}]   ;;  %s5336_s4 = inlined_call_operand.vmem [shape: f32[1,448], index: 4, kind: input, shape index: {}]   ;;  %s5337_s5 = inlined_call_operand.vmem [shape: f32[1,32], index: 5, kind: input, shape index: {}]   ;;  %s5338_s6 = inlined_call_operand.vmem [shape: f32[1,32], index: 6, kind: input, shape index: {}]   ;;  %s5339_s7 = inlined_call_operand.vmem [shape: f32[8,32], index: 7, kind: input, shape index: {}]   ;;  %s5340_s8 = inlined_call_operand.hbm [shape: f32[2,8,32], index: 8, kind: output, shape index: {}]  }
   0x1   :  { %15 = vsyncpa [#allocation3 + $0x1], 0  ;;  %s3916_s27 = smov 0   ;;  %s3918_s28 = smov 0  }
   0x2   :  { %s3920_s29 = smov 0   ;;  %s3922_s30 = smov 0  }
   0x3   :  { %s3924_s9 = smov 0   ;;  %s3926_s10 = smov 0  }
   0x4 LB: > { %s3302_s11 = sadd.s32 4294967295, %s3862_s10   ;;  %s3303_s12 = sadd.s32 4294967294, %s3862_s10   ;;  %s3862_s10 = sphi %s3926_s10, %s21_s10   ;;  %s3858_s9 = sphi %s3924_s9, %s5359_s9   ;;  %s3854_s30 = sphi %s3922_s30, %s5358_s30   ;;  %s3850_s29 = sphi %s3920_s29, %s5357_s29   ;;  %s3846_s28 = sphi %s3918_s28, %s5356_s28   ;;  %s3842_s27 = sphi %s3916_s27, %s5355_s27  }
   0x5   : > { %s33_s13 = sadd.s32 1, %s3858_s9  ;;  %s222_s14 = sadd.s32 1, %s3850_s29 }
   0x6   : > { %p35_p0 = scmp.ge.s32.totalorder %s33_s13, 2  ;;  %p232_p1 = scmp.ne.s32.totalorder %s3850_s29, %s3846_s28 }
   0x7   : > { %p233_p2 = scmp.eq.s32.totalorder %s3302_s11, 1  ;;  %p238_p3 = scmp.ne.s32.totalorder %s3846_s28, %s3842_s27 }
   0x8   : > { %s5361_s13 = smov (%p35_p0, %s33_s13), 0  ;;  %p239_p5 = scmp.eq.s32.totalorder %s3303_s12, 1 }
   0x9   : > { %p3956_p4 = por %p233_p2, %p232_p1  ;;  %s217_s16 = ssub.s32 %s3858_s9, %s5361_s13 }
   0xa   : > { %p3307_p6 = scmp.ge.s32.totalorder %s3862_s10, 1  ;;  %p220_p7 = scmp.eq.s32.totalorder %s217_s16, 0 }
   0xb   : > { %p3963_p8 = por %p239_p5, %p238_p3  ;;  %p294_p9 = scmp.lt.s32.totalorder %s3862_s10, 3 }
   0xc   : > { %s3969_s18 = scalar_select %p220_p7, %s3850_s29, %s222_s14  }
   0xd   : > { %p295_p10 = pnand %p3307_p6, %p294_p9 }
   0xf   : > { %298 = sbr.rel (%p295_p10) target bundleno = 1155 (0x483), region = 52 }
  0x14   : > { %v3318_v0 = vld [vmem:[%s5333_s1 + $0x90] sm:$0x11]  ;;  %vm446_vm0 = vcmask 1040384   ;;  %v3319_v1 = vld [vmem:[%s5333_s1 + $0x98] sm:$0x11]  ;;  %v3864_v3 = vmov 0  }
  0x15   : > { %v3341_v2 = vcombine.high %v3318_v0, %v3318_v0  ;;  %v3978_v4 = vsel %vm446_vm0, 65535, %v3864_v3  ;;  %v3343_v5 = vcombine.high %v3319_v1, %v3319_v1  ;;  %v3340_v6 = vcombine.low %v3318_v0, %v3318_v0  ;;  %493 = vmatprep.mubr.bf16.mxu0 %v3864_v3  ;;  %p336_p11 = scmp.lt.s32.totalorder %s3854_s30, 1  ;;  %536 = vmatprep.mubr.bf16.mxu1 %v3864_v3  ;;  %v3995_v11 = vld [vmem:[%s5333_s1 + $0x74] ss:$16 sps:$4 sm:$0xff]   ;;  %v4000_v12 = vld [vmem:[%s5333_s1 + $0x7c] ss:$16 sps:$4 sm:$0xff]  }
  0x16   : > { %v3342_v7 = vcombine.low %v3319_v1, %v3319_v1  ;;  %v4011_v14 = vld [vmem:[%s5333_s1 + $0x70] ss:$16 sps:$4 sm:$0xff]   ;;  %v4016_v15 = vld [vmem:[%s5333_s1 + $0x78] ss:$16 sps:$4 sm:$0xff]   ;;  %v4023_v16 = vld [vmem:[%s5333_s1 + $0x54] ss:$16 sps:$4 sm:$0xff]  }
  0x17   : > { %v3984_v8 = vand.u32 %v3341_v2, %v3978_v4  ;;  %v3987_v9 = vand.u32 %v3343_v5, %v3978_v4  ;;  %v3990_v10 = vand.u32 %v3340_v6, %v3978_v4  ;;  %s337_s11 = scalar_select %p336_p11, %s3854_s30, 1  ;;  %v358_v17 = vld [vmem:[%s5333_s1 + $0x40] sm:$0x11]  ;;  %v359_v18 = vld [vmem:[%s5333_s1 + $0x48] sm:$0x11]  ;;  %vm442_vm1 = vcmask 269312  }
  0x18   : > { %v4004_v13 = vand.u32 %v3342_v7, %v3978_v4  ;;  %v4036_v19 = vld [vmem:[%s5333_s1 + $0x5c] ss:$16 sps:$4 sm:$0xff]   ;;  %v3355_v20 = vcombine.high %v358_v17, %v358_v17  ;;  %v4046_v21 = vld [vmem:[%s5333_s1 + $0x50] ss:$16 sps:$4 sm:$0xff]   ;;  %v4051_v22 = vld [vmem:[%s5333_s1 + $0x58] ss:$16 sps:$4 sm:$0xff]   ;;  %v3357_v23 = vcombine.high %v359_v18, %v359_v18  ;;  %v3354_v26 = vcombine.low %v358_v17, %v358_v17 }
  0x19   : > { %471 = vmatprep.subr.bf16.mxu0 %v3984_v8  ;;  %514 = vmatprep.subr.bf16.mxu1 %v3987_v9  ;;  %s3618_s20 = smul.u32 96, %s337_s11  ;;  %v3356_v27 = vcombine.low %v359_v18, %v359_v18  ;;  %v4078_v33 = vld [vmem:[%s5333_s1 + $0x24] ss:$16 sps:$4 sm:$0xff]   ;;  %v4083_v34 = vld [vmem:[%s5333_s1 + $0x2c] ss:$16 sps:$4 sm:$0xff]   ;;  %vm1572_vm2 = vcmask 261120  }
  0x1a   : > { %472 = vmatpush1.bf16.msra.mxu0 %v3990_v10  ;;  %515 = vmatpush1.bf16.msra.mxu1 %v4004_v13  ;;  %v4060_v28 = vand.u32 %v3355_v20, %v3978_v4  ;;  %v4063_v29 = vand.u32 %v3357_v23, %v3978_v4  ;;  %v4068_v31 = vand.u32 %v3354_v26, %v3978_v4  ;;  %v3328_v35 = vld [vmem:[%s5333_s1 + $0xe0] sm:$0x11]  ;;  %v3329_v36 = vld [vmem:[%s5333_s1 + $0xe8] sm:$0x11]  ;;  %s3865_s22 = smov 32   ;;  %s3866_s23 = smov 64  }
  0x1b   : > { %473 = vmatprep.subr.bf16.mxu0 %v3995_v11  ;;  %516 = vmatprep.subr.bf16.mxu1 %v4000_v12  ;;  %s4041_s19 = scalar_lea.vmem %s5332_s0, %s3618_s20  ;;  %v4071_v32 = vand.u32 %v3356_v27, %v3978_v4  ;;  %v4096_v37 = vld [vmem:[%s5333_s1 + $0x20] ss:$16 sps:$4 sm:$0xff]   ;;  %v4103_v38 = vld [vmem:[%s5333_s1 + $0x28] ss:$16 sps:$4 sm:$0xff]   ;;  %v4110_v39 = vld [vmem:[%s5333_s1 + $0x4] ss:$16 sps:$4 sm:$0xff]   ;;  %v3371_v41 = vcombine.high %v3328_v35, %v3328_v35  ;;  %v3373_v42 = vcombine.high %v3329_v36, %v3329_v36 }
  0x1c   : > { %v3330_v24 = vld [vmem:[%s4041_s19 + $0x10] sm:$0xff]  ;;  %v3331_v25 = vld [vmem:[%s4041_s19 + $0x18] sm:$0x1]  ;;  %v4115_v40 = vld [vmem:[%s5333_s1 + $0xc] ss:$16 sps:$4 sm:$0xff]   ;;  %v3370_v47 = vcombine.low %v3328_v35, %v3328_v35  ;;  %v3372_v48 = vcombine.low %v3329_v36, %v3329_v36  ;;  %s3867_s24 = smov 96  }
  0x1d   : > { %v391_v30 = vpack.c.bf16 %v3331_v25, %v3330_v24  ;;  %v4122_v43 = vld [vmem:[%s5333_s1] ss:$16 sps:$4 sm:$0xff]   ;;  %v4129_v44 = vld [vmem:[%s5333_s1 + $0x8] ss:$16 sps:$4 sm:$0xff]   ;;  %v4136_v49 = vand.u32 %v3371_v41, %v3978_v4  ;;  %v4139_v50 = vand.u32 %v3373_v42, %v3978_v4  ;;  %v4144_v52 = vld [vmem:[%s5333_s1 + $0xc4] ss:$16 sps:$4 sm:$0xff]   ;;  %v862_v42 = vlaneseq }
  0x1e   : > { %474 = vmatpush1.bf16.msra.mxu0 %v4011_v14  ;;  %517 = vmatpush1.bf16.msra.mxu1 %v4016_v15  ;;  %v385_v45 = vld [vmem:[%s4041_s19] sm:$0xff]  ;;  %v386_v46 = vld [vmem:[%s4041_s19 + $0x8] sm:$0x1]  ;;  %v4149_v53 = vld [vmem:[%s5333_s1 + $0xcc] ss:$16 sps:$4 sm:$0xff]   ;;  %v4154_v54 = vand.u32 %v3370_v47, %v3978_v4  ;;  %v4157_v55 = vand.u32 %v3372_v48, %v3978_v4  ;;  %vm1828_vm3 = vcmask 523264  }
  0x1f   : > { %475 = vmatprep.subr.bf16.mxu0 %v4023_v16  ;;  %518 = vmatprep.subr.bf16.mxu1 %v4036_v19  ;;  %v387_v51 = vpack.c.bf16 %v386_v46, %v385_v45  ;;  %v4164_v56 = vld [vmem:[%s5333_s1 + $0xc0] ss:$16 sps:$4 sm:$0xff]   ;;  %v4169_v57 = vld [vmem:[%s5333_s1 + $0xc8] ss:$16 sps:$4 sm:$0xff]   ;;  %v4176_v58 = vld [vmem:[%s5333_s1 + $0xa4] ss:$16 sps:$4 sm:$0xff]  }
  0x20   : > { %v4181_v59 = vld [vmem:[%s5333_s1 + $0xac] ss:$16 sps:$4 sm:$0xff]   ;;  %v4190_v60 = vld [vmem:[%s5333_s1 + $0xa0] ss:$16 sps:$4 sm:$0xff]   ;;  %v4195_v61 = vld [vmem:[%s5333_s1 + $0xa8] ss:$16 sps:$4 sm:$0xff]  }
  0x21   : > { %v3360_v62 = vld [vmem:[%s4041_s19 + $0x20] sm:$0xff]  ;;  %v3361_v63 = vld [vmem:[%s4041_s19 + $0x28] sm:$0x1]  ;;  %v3376_v1 = vld [vmem:[%s4041_s19 + $0x30] sm:$0xff]  ;;  %v4463_v47 = vshrl.u32 %v862_v42, 7  ;;  %vm1930_vm4 = vcmask 785408  }
  0x22   : > { %476 = vmatpush1.bf16.msra.mxu0 %v4046_v21  ;;  %519 = vmatpush1.bf16.msra.mxu1 %v4051_v22  ;;  %v701_v0 = vpack.c.bf16 %v3361_v63, %v3360_v62  ;;  %v3377_v2 = vld [vmem:[%s4041_s19 + $0x38] sm:$0x1]  ;;  %v3382_v5 = vld [vmem:[%s4041_s19 + $0x40] sm:$0xff]  ;;  %v3383_v6 = vld [vmem:[%s4041_s19 + $0x48] sm:$0x1]  ;;  %vm3869_vm5 = vmmov 0  }
  0x23   : > { %622 = vmatprep.subr.bf16.mxu0 %v4060_v28  ;;  %665 = vmatprep.subr.bf16.mxu1 %v4063_v29  ;;  %v901_v4 = vpack.c.bf16 %v3377_v2, %v3376_v1  ;;  %v1080_v7 = vpack.c.bf16 %v3383_v6, %v3382_v5  ;;  %v4337_v17 = vld [vmem:[%s5334_s2 + $0x80] sm:$0xff]   ;;  %v4343_v18 = vld [vmem:[%s5334_s2 + $0x28] sm:$0xff]   ;;  %v4385_v24 = vld [vmem:[%s5334_s2 + $0x10] sm:$0xff]   ;;  %s3571_s20 = sshll.u32 %s3854_s30, 7 }
  0x24   : > { %v4357_v20 = vld [vmem:[%s5334_s2 + $0x20] sm:$0xff]   ;;  %v4379_v23 = vld [vmem:[%s5334_s2 + $0x68] sm:$0xff]   ;;  %v4407_v27 = vld [vmem:[%s5334_s2 + $0x58] sm:$0xff]   ;;  %s3208_s14 = scalar_lea.hbm %s5340_s8, %s3571_s20 }
  0x25   : > { %3344 = vmatmul.mubr.msk.bf16.vlgmr.msra.gmra.mxu0 %vm442_vm1, %v391_v30  ;;  %3345 = vmatmul.mubr.msk.bf16.vlgmr.msra.gmra.mxu1 %vm442_vm1, %v391_v30  ;;  %5351 = vst [vmem:[#allocation7_spill] sm:$0xff] %v4379_v23  ;;  %v4393_v25 = vld [vmem:[%s5334_s2 + $0x60] sm:$0xff]   ;;  %v4399_v26 = vld [vmem:[%s5334_s2 + $0x8] sm:$0xff]  }
  0x26   : > { %623 = vmatpush1.bf16.msra.mxu0 %v4068_v31  ;;  %666 = vmatpush1.bf16.msra.mxu1 %v4071_v32  ;;  %v4427_v30 = vld [vmem:[%s5334_s2 + $0x48] sm:$0xff]  }
  0x27   : > { %624 = vmatprep.subr.bf16.mxu0 %v4078_v33  ;;  %667 = vmatprep.subr.bf16.mxu1 %v4083_v34 }
  0x28   : > { %644 = vmatprep.mubr.bf16.mxu0 %v3864_v3  ;;  %687 = vmatprep.mubr.bf16.mxu1 %v3864_v3 }
  0x2a   : > { %625 = vmatpush1.bf16.msra.mxu0 %v4096_v37  ;;  %668 = vmatpush1.bf16.msra.mxu1 %v4103_v38 }
  0x2b   : > { %626 = vmatprep.subr.bf16.mxu0 %v4110_v39  ;;  %669 = vmatprep.subr.bf16.mxu1 %v4115_v40 }
  0x2e   : > { %627 = vmatpush1.bf16.msra.mxu0 %v4122_v43  ;;  %670 = vmatpush1.bf16.msra.mxu1 %v4129_v44 }
  0x2f   : > { %777 = vmatprep.subr.bf16.mxu0 %v4136_v49  ;;  %820 = vmatprep.subr.bf16.mxu1 %v4139_v50 }
  0x31   : > { %3358 = vmatmul.mubr.msk.bf16.vlgmr.msra.gmra.mxu0 %vm442_vm1, %v387_v51  ;;  %3359 = vmatmul.mubr.msk.bf16.vlgmr.msra.gmra.mxu1 %vm442_vm1, %v387_v51 }
  0x32   : > { %778 = vmatpush1.bf16.msra.mxu0 %v4154_v54  ;;  %821 = vmatpush1.bf16.msra.mxu1 %v4157_v55 }
  0x33   : > { %779 = vmatprep.subr.bf16.mxu0 %v4144_v52  ;;  %822 = vmatprep.subr.bf16.mxu1 %v4149_v53 }
  0x34   : > { %799 = vmatprep.mubr.bf16.mxu0 %v3864_v3  ;;  %842 = vmatprep.mubr.bf16.mxu1 %v3864_v3 }
  0x36   : > { %780 = vmatpush1.bf16.msra.mxu0 %v4164_v56  ;;  %823 = vmatpush1.bf16.msra.mxu1 %v4169_v57 }
  0x37   : > { %781 = vmatprep.subr.bf16.mxu0 %v4176_v58  ;;  %824 = vmatprep.subr.bf16.mxu1 %v4181_v59 }
  0x3a   : > { %782 = vmatpush1.bf16.msra.mxu0 %v4190_v60  ;;  %825 = vmatpush1.bf16.msra.mxu1 %v4195_v61 }
  0x3b   : > { %915 = vmatprep.subr.bf16.mxu0 %v3984_v8  ;;  %958 = vmatprep.subr.bf16.mxu1 %v3987_v9 }
  0x3d   : > { %3374 = vmatmul.mubr.msk.bf16.vlgmr.msra.gmra.mxu0 %vm442_vm1, %v701_v0  ;;  %3375 = vmatmul.mubr.msk.bf16.vlgmr.msra.gmra.mxu1 %vm442_vm1, %v701_v0 }
  0x3e   : > { %916 = vmatpush1.bf16.msra.mxu0 %v3990_v10  ;;  %959 = vmatpush1.bf16.msra.mxu1 %v4004_v13 }
  0x3f   : > { %917 = vmatprep.subr.bf16.mxu0 %v3995_v11  ;;  %960 = vmatprep.subr.bf16.mxu1 %v4000_v12 }
  0x40   : > { %937 = vmatprep.mubr.bf16.mxu0 %v3864_v3  ;;  %980 = vmatprep.mubr.bf16.mxu1 %v3864_v3 }
  0x42   : > { %918 = vmatpush1.bf16.msra.mxu0 %v4011_v14  ;;  %961 = vmatpush1.bf16.msra.mxu1 %v4016_v15 }
  0x43   : > { %919 = vmatprep.subr.bf16.mxu0 %v4023_v16  ;;  %962 = vmatprep.subr.bf16.mxu1 %v4036_v19 }
  0x46   : > { %920 = vmatpush1.bf16.msra.mxu0 %v4046_v21  ;;  %963 = vmatpush1.bf16.msra.mxu1 %v4051_v22 }
  0x47   : > { %1001 = vmatprep.subr.bf16.mxu0 %v4060_v28  ;;  %1044 = vmatprep.subr.bf16.mxu1 %v4063_v29 }
  0x49   : > { %3378 = vmatmul.mubr.msk.bf16.vlgmr.msra.gmra.mxu0 %vm442_vm1, %v901_v4  ;;  %3379 = vmatmul.mubr.msk.bf16.vlgmr.msra.gmra.mxu1 %vm442_vm1, %v901_v4 }
  0x4a   : > { %1002 = vmatpush1.bf16.msra.mxu0 %v4068_v31  ;;  %1045 = vmatpush1.bf16.msra.mxu1 %v4071_v32 }
  0x4b   : > { %1003 = vmatprep.subr.bf16.mxu0 %v4078_v33  ;;  %1046 = vmatprep.subr.bf16.mxu1 %v4083_v34 }
  0x4c   : > { %1023 = vmatprep.mubr.bf16.mxu0 %v3864_v3  ;;  %1066 = vmatprep.mubr.bf16.mxu1 %v3864_v3 }
  0x4e   : > { %1004 = vmatpush1.bf16.msra.mxu0 %v4096_v37  ;;  %1047 = vmatpush1.bf16.msra.mxu1 %v4103_v38 }
  0x4f   : > { %1005 = vmatprep.subr.bf16.mxu0 %v4110_v39  ;;  %1048 = vmatprep.subr.bf16.mxu1 %v4115_v40 }
  0x52   : > { %1006 = vmatpush1.bf16.msra.mxu0 %v4122_v43  ;;  %1049 = vmatpush1.bf16.msra.mxu1 %v4129_v44 }
  0x53   : > { %1094 = vmatprep.subr.bf16.mxu0 %v4136_v49  ;;  %1137 = vmatprep.subr.bf16.mxu1 %v4139_v50 }
  0x55   : > { %3380 = vmatmul.mubr.msk.bf16.vlgmr.msra.gmra.mxu0 %vm442_vm1, %v701_v0  ;;  %3381 = vmatmul.mubr.msk.bf16.vlgmr.msra.gmra.mxu1 %vm442_vm1, %v701_v0 }
  0x56   : > { %1095 = vmatpush1.bf16.msra.mxu0 %v4154_v54  ;;  %1138 = vmatpush1.bf16.msra.mxu1 %v4157_v55 }
  0x57   : > { %1096 = vmatprep.subr.bf16.mxu0 %v4144_v52  ;;  %1139 = vmatprep.subr.bf16.mxu1 %v4149_v53 }
  0x58   : > { %1116 = vmatprep.mubr.bf16.mxu0 %v3864_v3  ;;  %1159 = vmatprep.mubr.bf16.mxu1 %v3864_v3 }
  0x5a   : > { %1097 = vmatpush1.bf16.msra.mxu0 %v4164_v56  ;;  %1140 = vmatpush1.bf16.msra.mxu1 %v4169_v57 }
  0x5b   : > { %1098 = vmatprep.subr.bf16.mxu0 %v4176_v58  ;;  %1141 = vmatprep.subr.bf16.mxu1 %v4181_v59 }
  0x5e   : > { %1099 = vmatpush1.bf16.msra.mxu0 %v4190_v60  ;;  %1142 = vmatpush1.bf16.msra.mxu1 %v4195_v61 }
  0x5f   : > { %1211 = vmatprep.subr.bf16.mxu0 %v3984_v8  ;;  %1252 = vmatprep.subr.bf16.mxu1 %v3987_v9  ;;  %v3386_v8 = vld [vmem:[%s4041_s19 + $0x50] sm:$0xff]  ;;  %v3387_v9 = vld [vmem:[%s4041_s19 + $0x58] sm:$0x1] }
  0x61   : > { %3384 = vmatmul.mubr.msk.bf16.vlgmr.msra.gmra.mxu0 %vm442_vm1, %v1080_v7  ;;  %3385 = vmatmul.mubr.msk.bf16.vlgmr.msra.gmra.mxu1 %vm442_vm1, %v1080_v7 }
  0x62   : > { %1212 = vmatpush1.bf16.msra.mxu0 %v3990_v10  ;;  %1253 = vmatpush1.bf16.msra.mxu1 %v4004_v13  ;;  %v1197_v10 = vpack.c.bf16 %v3387_v9, %v3386_v8 }
  0x63   : > { %1213 = vmatprep.subr.bf16.mxu0 %v3995_v11  ;;  %1254 = vmatprep.subr.bf16.mxu1 %v4000_v12  ;;  %v1365_v11 = vld [vmem:[%s4041_s19 + $0x1] sm:$0xff]  ;;  %v1366_v12 = vld [vmem:[%s4041_s19 + $0x9] sm:$0x1]  ;;  %s333_s19 = sand.u32 1, %s3846_s28  }
  0x64   : > { %1233 = vmatprep.mubr.bf16.mxu0 %v3864_v3  ;;  %1274 = vmatprep.mubr.bf16.mxu1 %v3864_v3  ;;  %v1367_v13 = vpack.c.bf16 %v1366_v12, %v1365_v11  ;;  %s3308_s16 = sshll.u32 %s333_s19, 3  ;;  %s3196_s21 = scalar_lea.sflag [#allocation3], %s333_s19 }
  0x65   : > { %s335_s25 = scalar_lea.vmem [#allocation2], %s3308_s16 }
  0x66   : > { %1214 = vmatpush1.bf16.msra.mxu0 %v4011_v14  ;;  %1255 = vmatpush1.bf16.msra.mxu1 %v4016_v15  ;;  %v4314_v14 = vld [vmem:[%s5334_s2 + $0x38] sm:$0xff]   ;;  %v4321_v15 = vld [vmem:[%s5334_s2 + $0x88] sm:$0xff]   ;;  %s3210_s26 = sshll.u32 %s335_s25, 4  ;;  %s3211_s26 = int_to_ptr.vmem [resolvable:$true] %s3210_s26 }
  0x67   : > { %1215 = vmatprep.subr.bf16.mxu0 %v4023_v16  ;;  %1256 = vmatprep.subr.bf16.mxu1 %v4036_v19  ;;  %v4329_v16 = vld [vmem:[%s5334_s2 + $0x30] sm:$0xff]   ;;  %v4351_v19 = vld [vmem:[%s5334_s2 + $0x78] sm:$0xff]  }
  0x68   : > { %5349 = vst [vmem:[#allocation5_spill] sm:$0xff] %v4351_v19 }
  0x6a   : > { %1216 = vmatpush1.bf16.msra.mxu0 %v4046_v21  ;;  %1257 = vmatpush1.bf16.msra.mxu1 %v4051_v22  ;;  %v4365_v21 = vld [vmem:[%s5334_s2 + $0x70] sm:$0xff]   ;;  %v4371_v22 = vld [vmem:[%s5334_s2 + $0x18] sm:$0xff]  }
  0x6b   : > { %1293 = vmatprep.subr.bf16.mxu0 %v4060_v28  ;;  %1334 = vmatprep.subr.bf16.mxu1 %v4063_v29  ;;  %5350 = vst [vmem:[#allocation6_spill] sm:$0xff] %v4365_v21  ;;  %v4413_v28 = vld [vmem:[%s5334_s2] sm:$0xff]   ;;  %v4421_v29 = vld [vmem:[%s5334_s2 + $0x50] sm:$0xff]  }
  0x6d   : > { %3388 = vmatmul.mubr.msk.bf16.vlgmr.msra.gmra.mxu0 %vm442_vm1, %v1197_v10  ;;  %3389 = vmatmul.mubr.msk.bf16.vlgmr.msra.gmra.mxu1 %vm442_vm1, %v1197_v10 }
  0x6e   : > { %1294 = vmatpush1.bf16.msra.mxu0 %v4068_v31  ;;  %1335 = vmatpush1.bf16.msra.mxu1 %v4071_v32  ;;  %v4435_v31 = vld [vmem:[%s5334_s2 + $0x98] sm:$0xff]   ;;  %v4441_v32 = vld [vmem:[%s5334_s2 + $0x40] sm:$0xff]  }
  0x6f   : > { %1295 = vmatprep.subr.bf16.mxu0 %v4078_v33  ;;  %1336 = vmatprep.subr.bf16.mxu1 %v4083_v34  ;;  %v4449_v33 = vld [vmem:[%s5334_s2 + $0x90] sm:$0xff]  }
  0x70   : > { %1315 = vmatprep.mubr.bf16.mxu0 %v3864_v3  ;;  %1356 = vmatprep.mubr.bf16.mxu1 %v3864_v3 }
  0x72   : > { %1296 = vmatpush1.bf16.msra.mxu0 %v4096_v37  ;;  %1337 = vmatpush1.bf16.msra.mxu1 %v4103_v38 }
  0x73   : > { %1297 = vmatprep.subr.bf16.mxu0 %v4110_v39  ;;  %1338 = vmatprep.subr.bf16.mxu1 %v4115_v40 }
  0x76   : > { %1298 = vmatpush1.bf16.msra.mxu0 %v4122_v43  ;;  %1339 = vmatpush1.bf16.msra.mxu1 %v4129_v44 }
  0x77   : > { %1381 = vmatprep.subr.bf16.mxu0 %v4136_v49  ;;  %1422 = vmatprep.subr.bf16.mxu1 %v4139_v50 }
  0x79   : > { %3390 = vmatmul.mubr.msk.bf16.vlgmr.msra.gmra.mxu0 %vm442_vm1, %v1080_v7  ;;  %3391 = vmatmul.mubr.msk.bf16.vlgmr.msra.gmra.mxu1 %vm442_vm1, %v1080_v7 }
  0x7a   : > { %1382 = vmatpush1.bf16.msra.mxu0 %v4154_v54  ;;  %1423 = vmatpush1.bf16.msra.mxu1 %v4157_v55  ;;  %v864_v55 = vsub.s32 0, %v4463_v47 }
  0x7b   : > { %1383 = vmatprep.subr.bf16.mxu0 %v4144_v52  ;;  %1424 = vmatprep.subr.bf16.mxu1 %v4149_v53 }
  0x7c   : > { %1403 = vmatprep.mubr.bf16.mxu0 %v3864_v3  ;;  %1444 = vmatprep.mubr.bf16.mxu1 %v3864_v3 }
  0x7e   : > { %1384 = vmatpush1.bf16.msra.mxu0 %v4164_v56  ;;  %1425 = vmatpush1.bf16.msra.mxu1 %v4169_v57  ;;  %v4469_v57 = vld [vmem:[%s5336_s4] sm:$0xf] }
  0x7f   : > { %1385 = vmatprep.subr.bf16.mxu0 %v4176_v58  ;;  %1426 = vmatprep.subr.bf16.mxu1 %v4181_v59  ;;  %v868_v58 = vsub.s32 1, %v4463_v47 }
  0x81   : > { %v4478_v1 = vrot.slane %v4469_v57, %v868_v58 }
  0x82   : > { %1386 = vmatpush1.bf16.msra.mxu0 %v4190_v60  ;;  %1427 = vmatpush1.bf16.msra.mxu1 %v4195_v61  ;;  %v4473_v60 = vrot.slane %v4469_v57, %v864_v55 }
  0x83   : > { %1679 = vmatprep.subr.bf16.mxu1 %v3864_v3  ;;  %1576 = vmatprep.subr.bf16.mxu0 %v3864_v3 }
  0x85   : > { %3392 = vmatmul.mubr.msk.bf16.vlgmr.msra.gmra.mxu0 %vm442_vm1, %v1367_v13  ;;  %3393 = vmatmul.mubr.msk.bf16.vlgmr.msra.gmra.mxu1 %vm442_vm1, %v1367_v13 }
  0x86   : > { %1680 = vmatpush1.bf16.msra.mxu1 %v4314_v14  ;;  %1577 = vmatpush1.bf16.msra.mxu0 %v4321_v15 }
  0x87   : > { %1681 = vmatprep.subr.bf16.mxu1 %v3864_v3  ;;  %1578 = vmatprep.subr.bf16.mxu0 %v3864_v3 }
  0x8a   : > { %1682 = vmatpush1.bf16.msra.mxu1 %v4329_v16  ;;  %1579 = vmatpush1.bf16.msra.mxu0 %v4337_v17 }
  0x8b   : > { %1683 = vmatprep.subr.bf16.mxu1 %v3864_v3  ;;  %1580 = vmatprep.subr.bf16.mxu0 %v3864_v3 }
  0x8e   : > { %1684 = vmatpush1.bf16.msra.mxu1 %v4343_v18  ;;  %1581 = vmatpush1.bf16.msra.mxu0 %v4351_v19 }
  0x8f   : > { %1685 = vmatprep.subr.bf16.mxu1 %v3864_v3  ;;  %1582 = vmatprep.subr.bf16.mxu0 %v3864_v3 }
  0x92   : > { %1686 = vmatpush1.bf16.msra.mxu1 %v4357_v20  ;;  %1583 = vmatpush1.bf16.msra.mxu0 %v4365_v21 }
  0x93   : > { %1687 = vmatprep.subr.bf16.mxu1 %v3864_v3  ;;  %1584 = vmatprep.subr.bf16.mxu0 %v3864_v3 }
  0x96   : > { %1688 = vmatpush1.bf16.msra.mxu1 %v4371_v22  ;;  %1585 = vmatpush1.bf16.msra.mxu0 %v4379_v23 }
  0x97   : > { %1689 = vmatprep.subr.bf16.mxu1 %v3864_v3  ;;  %1586 = vmatprep.subr.bf16.mxu0 %v3864_v3 }
  0x9a   : > { %1690 = vmatpush1.bf16.msra.mxu1 %v4385_v24  ;;  %1587 = vmatpush1.bf16.msra.mxu0 %v4393_v25 }
  0x9b   : > { %1691 = vmatprep.subr.bf16.mxu1 %v3864_v3  ;;  %1588 = vmatprep.subr.bf16.mxu0 %v3864_v3 }
  0x9e   : > { %1692 = vmatpush1.bf16.msra.mxu1 %v4399_v26  ;;  %1589 = vmatpush1.bf16.msra.mxu0 %v4407_v27 }
  0x9f   : > { %1693 = vmatprep.subr.bf16.mxu1 %v3864_v3  ;;  %1590 = vmatprep.subr.bf16.mxu0 %v3864_v3 }
  0xa2   : > { %1694 = vmatpush1.bf16.msra.mxu1 %v4413_v28  ;;  %1591 = vmatpush1.bf16.msra.mxu0 %v4421_v29 }
  0xa3   : > { %1707 = vmatprep.subr.bf16.mxu1 %v3864_v3  ;;  %1604 = vmatprep.subr.bf16.mxu0 %v3864_v3 }
  0xa6   : > { %1708 = vmatpush2.bf16.msra.mxu1 %v4427_v30  ;;  %1605 = vmatpush2.bf16.msra.mxu0 %v4435_v31 }
  0xa7   : > { %1709 = vmatprep.subr.bf16.mxu1 %v3864_v3  ;;  %1606 = vmatprep.subr.bf16.mxu0 %v3864_v3 }
  0xaa   : > { %1710 = vmatpush2.bf16.msra.mxu1 %v4441_v32  ;;  %1607 = vmatpush2.bf16.msra.mxu0 %v4449_v33 }
  0xab   : > { %1782 = vmatprep.subr.bf16.mxu1 %v3864_v3  ;;  %1731 = vmatprep.subr.bf16.mxu0 %v3864_v3 }
  0xe5   : > { %v495_v34 = vpop.f32.mrf.mxu0  ;;  %v4455_v35 = vpop.f32.mrf.mxu1 }
  0xe7   : > { %v497_v36 = vpop.f32.mrf.mxu0  ;;  %v4457_v37 = vpop.f32.mrf.mxu1 }
  0xe9   : > { %v542_v38 = vpop.f32.mrf.mxu1  ;;  %v499_v39 = vpop.f32.mrf.mxu0 }
  0xeb   : > { %v544_v40 = vpop.f32.mrf.mxu1  ;;  %v501_v41 = vpop.f32.mrf.mxu0 }
  0xf1   : > { %v646_v43 = vpop.f32.mrf.mxu0  ;;  %v4459_v44 = vpop.f32.mrf.mxu1 }
  0xf2   : > { %v647_v59 = vadd.f32 %v646_v43, %v495_v34 }
  0xf3   : > { %v648_v45 = vpop.f32.mrf.mxu0  ;;  %v4461_v46 = vpop.f32.mrf.mxu1 }
  0xf4   : > { %v649_v63 = vadd.f32 %v648_v45, %v497_v36 }
  0xf5   : > { %v650_v48 = vpop.f32.mrf.mxu0  ;;  %v693_v49 = vpop.f32.mrf.mxu1 }
  0xf6   : > { %v651_v50 = vadd.f32 %v650_v48, %v499_v39  ;;  %v694_v51 = vadd.f32 %v693_v49, %v542_v38 }
  0xf7   : > { %v652_v52 = vpop.f32.mrf.mxu0  ;;  %v695_v53 = vpop.f32.mrf.mxu1 }
  0xf8   : > { %v653_v54 = vadd.f32 %v652_v52, %v501_v41  ;;  %v696_v56 = vadd.f32 %v695_v53, %v544_v40 }
  0xfd   : > { %v801_v61 = vpop.f32.mrf.mxu0  ;;  %v4475_v62 = vpop.f32.mrf.mxu1 }
  0xfe   : > { %v853_v0 = vadd.f32 %v801_v61, %v647_v59 }
  0xff   : > { %v803_v2 = vpop.f32.mrf.mxu0  ;;  %v4480_v4 = vpop.f32.mrf.mxu1 }
 0x100   : > { %v882_v5 = vadd.f32 %v4473_v60, %v853_v0  ;;  %v854_v6 = vadd.f32 %v803_v2, %v649_v63 }
 0x101   : > { %v805_v7 = vpop.f32.mrf.mxu0  ;;  %v848_v8 = vpop.f32.mrf.mxu1 }
 0x102   : > { %v890_v9 = vmax.f32 %v882_v5, 0.0  ;;  %v883_v10 = vadd.f32 %v4478_v1, %v854_v6  ;;  %v857_v11 = vadd.f32 %v805_v7, %v651_v50  ;;  %v4484_v13 = vadd.f32 %v848_v8, %v694_v51 }
 0x103   : > { %v807_v12 = vpop.f32.mrf.mxu0  ;;  %v850_v34 = vpop.f32.mrf.mxu1  ;;  %v872_v8 = vsub.s32 2, %v4463_v47 }
 0x104   : > { %v891_v36 = vmax.f32 %v883_v10, 0.0  ;;  %v886_v38 = vadd.f32 %v4473_v60, %v857_v11  ;;  %v858_v39 = vadd.f32 %v807_v12, %v653_v54  ;;  %v1485_v40 = vpack.c.bf16 %v890_v9, %v890_v9 }
 0x105   : > { %v4487_v41 = vadd.f32 %v850_v34, %v696_v56  ;;  %v690_v10 = vadd.f32 %v4459_v44, %v4455_v35 }
 0x106   : > { %v4489_v42 = vpack.c.bf16 %v891_v36, %v891_v36  ;;  %v894_v43 = vmax.f32 %v886_v38, 0.0  ;;  %v887_v45 = vadd.f32 %v4478_v1, %v858_v39  ;;  %1773 = vrot.lane.b32.xlu1 %v1485_v40, %s3865_s22 }
 0x107   : > { %v855_v35 = vadd.f32 %v4475_v62, %v690_v10  ;;  %v692_v62 = vadd.f32 %v4461_v46, %v4457_v37 }
 0x108   : > { %v4493_v48 = vpack.c.bf16 %v894_v43, %v890_v9  ;;  %v895_v49 = vmax.f32 %v887_v45, 0.0  ;;  %3435 = vmatprep.mubr.msk.bf16.mxu1 %vm1572_vm2, %v4489_v42 }
 0x109   : > { %v939_v50 = vpop.f32.mrf.mxu0  ;;  %1712 = vmatmul.mubr.bf16.vlgmr.msra.gmra.mxu1 %v1485_v40  ;;  %v982_v51 = vpop.f32.mrf.mxu1  ;;  %v4534_v40 = vrot.slane %v4469_v57, %v872_v8 }
 0x10a   : > { %v4497_v52 = vpack.c.bf16 %v895_v49, %v891_v36  ;;  %1775 = vrot.lane.b32.xlu1 %v4489_v42, %s3865_s22  ;;  %1783 = vmatpush1.bf16.msra.mxu1 %v4314_v14  ;;  %v876_v36 = vsub.s32 3, %v4463_v47 }
 0x10b   : > { %v941_v53 = vpop.f32.mrf.mxu0  ;;  %v984_v54 = vpop.f32.mrf.mxu1  ;;  %1784 = vmatprep.subr.bf16.mxu1 %v3864_v3  ;;  %v884_v8 = vadd.f32 %v4534_v40, %v855_v35 }
 0x10d   : > { %v4503_v55 = vpop.f32.mrf.mxu1  ;;  %v4506_v56 = vpop.f32.mrf.mxu0  ;;  %v4569_v46 = vmax.f32 %v884_v8, 0.0 }
 0x10e   : > { %1785 = vmatpush1.bf16.msra.mxu1 %v4329_v16 }
 0x10f   : > { %1786 = vmatprep.subr.bf16.mxu1 %v3864_v3  ;;  %v4509_v58 = vpop.f32.mrf.mxu1  ;;  %v4512_v59 = vpop.f32.mrf.mxu0 }
 0x112   : > { %1787 = vmatpush1.bf16.msra.mxu1 %v4343_v18 }
 0x113   : > { %1788 = vmatprep.subr.bf16.mxu1 %v3864_v3 }
 0x115   : > { %v1025_v61 = vpop.f32.mrf.mxu0  ;;  %v1068_v63 = vpop.f32.mrf.mxu1 }
 0x116   : > { %1789 = vmatpush1.bf16.msra.mxu1 %v4357_v20  ;;  %v1069_v9 = vadd.f32 %v1068_v63, %v982_v51  ;;  %v1026_v12 = vadd.f32 %v1025_v61, %v939_v50  ;;  %v4542_v63 = vrot.slane %v4469_v57, %v876_v36 }
 0x117   : > { %v1027_v0 = vpop.f32.mrf.mxu0  ;;  %v1070_v2 = vpop.f32.mrf.mxu1  ;;  %1790 = vmatprep.subr.bf16.mxu1 %v3864_v3 }
 0x118   : > { %v1071_v34 = vadd.f32 %v1070_v2, %v984_v54  ;;  %v1028_v43 = vadd.f32 %v1027_v0, %v941_v53 }
 0x119   : > { %v4517_v5 = vpop.f32.mrf.mxu1  ;;  %v4520_v6 = vpop.f32.mrf.mxu0 }
 0x11a   : > { %1791 = vmatpush1.bf16.msra.mxu1 %v4371_v22 }
 0x11b   : > { %1792 = vmatprep.subr.bf16.mxu1 %v3864_v3  ;;  %v4523_v7 = vpop.f32.mrf.mxu1  ;;  %v4529_v11 = vpop.f32.mrf.mxu0 }
 0x11e   : > { %1793 = vmatpush1.bf16.msra.mxu1 %v4385_v24 }
 0x11f   : > { %1794 = vmatprep.subr.bf16.mxu1 %v3864_v3 }
 0x121   : > { %v1118_v38 = vpop.f32.mrf.mxu0  ;;  %v1161_v39 = vpop.f32.mrf.mxu1 }
 0x122   : > { %v1170_v45 = vadd.f32 %v1118_v38, %v1026_v12  ;;  %v1172_v49 = vadd.f32 %v1161_v39, %v1069_v9  ;;  %1795 = vmatpush1.bf16.msra.mxu1 %v4399_v26  ;;  %v856_v38 = vadd.f32 %v4480_v4, %v692_v62 }
 0x123   : > { %v1120_v44 = vpop.f32.mrf.mxu0  ;;  %v1163_v51 = vpop.f32.mrf.mxu1  ;;  %1796 = vmatprep.subr.bf16.mxu1 %v3864_v3 }
 0x124   : > { %v1178_v50 = vadd.f32 %v1170_v45, %v4473_v60  ;;  %v1180_v47 = vadd.f32 %v1172_v49, %v4534_v40  ;;  %v1171_v54 = vadd.f32 %v1120_v44, %v1028_v43  ;;  %v1173_v61 = vadd.f32 %v1163_v51, %v1071_v34 }
 0x125   : > { %v4553_v9 = vpop.f32.mrf.mxu0  ;;  %v4556_v12 = vpop.f32.mrf.mxu1  ;;  %v1487_v49 = vpack.c.bf16 %v4569_v46, %v4569_v46  ;;  %v885_v4 = vadd.f32 %v4542_v63, %v856_v38 }
 0x126   : > { %v4544_v53 = vmax.f32 %v1178_v50, 0.0  ;;  %v4546_v0 = vmax.f32 %v1180_v47, 0.0  ;;  %v1179_v2 = vadd.f32 %v1171_v54, %v4478_v1  ;;  %1797 = vmatpush1.bf16.msra.mxu1 %v4413_v28  ;;  %v1181_v10 = vadd.f32 %v1173_v61, %v4542_v63 }
 0x127   : > { %1810 = vmatprep.subr.bf16.mxu1 %v3864_v3  ;;  %v4572_v39 = vpop.f32.mrf.mxu0  ;;  %v4577_v45 = vpop.f32.mrf.mxu1 }
 0x128   : > { %v4559_v57 = vmax.f32 %v1179_v2, 0.0  ;;  %v1510_v34 = vpack.c.bf16 %v4544_v53, %v4544_v53  ;;  %v1822_v36 = vpack.c.bf16 %v4546_v0, %v4546_v0  ;;  %v4574_v43 = vmax.f32 %v1181_v10, 0.0 }
 0x129   : > { %v4594_v2 = vmax.f32 %v885_v4, 0.0 }
 0x12a   : > { %v1511_v37 = vpack.c.bf16 %v4559_v57, %v4559_v57  ;;  %1721 = vrot.lane.b32.xlu0 %v1510_v34, %s3865_s22  ;;  %1811 = vmatpush2.bf16.msra.mxu1 %v4427_v30  ;;  %v1924_v51 = vpack.c.bf16 %v4574_v43, %v4574_v43 }
 0x12b   : > { %1826 = vrot.lane.b32.xlu1 %v1822_v36, %s3866_s23  ;;  %1812 = vmatprep.subr.bf16.mxu1 %v3864_v3  ;;  %v1488_v10 = vpack.c.bf16 %v4594_v2, %v4594_v2 }
 0x12c   : > { %3424 = vmatprep.mubr.msk.bf16.mxu0 %vm1572_vm2, %v1511_v37 }
 0x12d   : > { %1609 = vmatmul.mubr.bf16.vlgmr.msra.gmra.mxu0 %v1510_v34  ;;  %v1235_v35 = vpop.f32.mrf.mxu0  ;;  %v1276_v44 = vpop.f32.mrf.mxu1 }
 0x12e   : > { %1723 = vrot.lane.b32.xlu0 %v1511_v37, %s3865_s22  ;;  %1732 = vmatpush1.bf16.msra.mxu0 %v4321_v15 }
 0x12f   : > { %1877 = vrot.lane.b32.xlu1 %v1487_v49, %s3866_s23  ;;  %v1237_v50 = vpop.f32.mrf.mxu0  ;;  %v1278_v47 = vpop.f32.mrf.mxu1  ;;  %1813 = vmatpush2.bf16.msra.mxu1 %v4441_v32 }
 0x130   : > { %1733 = vmatprep.subr.bf16.mxu0 %v3864_v3  ;;  %1884 = vmatprep.subr.bf16.mxu1 %v3864_v3 }
 0x131   : > { %v1239_v54 = vpop.f32.mrf.mxu0  ;;  %v1280_v61 = vpop.f32.mrf.mxu1 }
 0x132   : > { %1824 = vrot.lane.b32.xlu0 %v1511_v37, %s3866_s23  ;;  %1734 = vmatpush1.bf16.msra.mxu0 %v4337_v17 }
 0x133   : > { %1928 = vrot.lane.b32.xlu1 %v1924_v51, %s3867_s24  ;;  %v1240_v62 = vpop.f32.mrf.mxu0  ;;  %v1281_v8 = vpop.f32.mrf.mxu1  ;;  %1735 = vmatprep.subr.bf16.mxu0 %v3864_v3 }
 0x136   : > { %1875 = vrot.lane.b32.xlu0 %v4489_v42, %s3866_s23  ;;  %1736 = vmatpush1.bf16.msra.mxu0 %v4351_v19 }
 0x137   : > { %1979 = vrot.lane.b32.xlu1 %v1488_v10, %s3867_s24  ;;  %1737 = vmatprep.subr.bf16.mxu0 %v3864_v3 }
 0x139   : > { %v1317_v34 = vpop.f32.mrf.mxu0  ;;  %v1358_v37 = vpop.f32.mrf.mxu1 }
 0x13a   : > { %1926 = vrot.lane.b32.xlu0 %v1822_v36, %s3867_s24  ;;  %1738 = vmatpush1.bf16.msra.mxu0 %v4365_v21  ;;  %v1318_v62 = vadd.f32 %v1317_v34, %v1235_v35  ;;  %v1359_v8 = vadd.f32 %v1358_v37, %v1276_v44 }
 0x13b   : > { %v1319_v38 = vpop.f32.mrf.mxu0  ;;  %v1360_v4 = vpop.f32.mrf.mxu1  ;;  %1739 = vmatprep.subr.bf16.mxu0 %v3864_v3 }
 0x13c   : > { %v1320_v36 = vadd.f32 %v1319_v38, %v1237_v50  ;;  %v1361_v10 = vadd.f32 %v1360_v4, %v1278_v47  ;;  %v888_v50 = vadd.f32 %v4534_v40, %v4484_v13  ;;  %v1030_v47 = vadd.f32 %v4520_v6, %v4506_v56 }
 0x13d   : > { %v1321_v51 = vpop.f32.mrf.mxu0  ;;  %v1362_v54 = vpop.f32.mrf.mxu1  ;;  %v1032_v4 = vadd.f32 %v4529_v11, %v4512_v59 }
 0x13e   : > { %1977 = vrot.lane.b32.xlu0 %v1487_v49, %s3867_s24  ;;  %1740 = vmatpush1.bf16.msra.mxu0 %v4379_v23 }
 0x13f   : > { %v1322_v42 = vpop.f32.mrf.mxu0  ;;  %v1363_v61 = vpop.f32.mrf.mxu1  ;;  %1741 = vmatprep.subr.bf16.mxu0 %v3864_v3  ;;  %v1175_v59 = vadd.f32 %v4572_v39, %v1032_v4  ;;  %v1075_v39 = vadd.f32 %v4523_v7, %v4509_v58 }
 0x140   : > { %v1174_v61 = vadd.f32 %v4553_v9, %v1030_v47 }
 0x141   : > { %v1177_v47 = vadd.f32 %v4577_v45, %v1075_v39 }
 0x142   : > { %1742 = vmatpush1.bf16.msra.mxu0 %v4393_v25  ;;  %v1182_v9 = vadd.f32 %v1174_v61, %v4473_v60 }
 0x143   : > { %1743 = vmatprep.subr.bf16.mxu0 %v3864_v3 }
 0x145   : > { %v1405_v21 = vpop.f32.mrf.mxu0  ;;  %v1446_v19 = vpop.f32.mrf.mxu1 }
 0x146   : > { %v1453_v51 = vadd.f32 %v1405_v21, %v1318_v62  ;;  %v1455_v54 = vadd.f32 %v1446_v19, %v1359_v8  ;;  %1744 = vmatpush1.bf16.msra.mxu0 %v4407_v27 }
 0x147   : > { %v1407_v49 = vpop.f32.mrf.mxu0  ;;  %v1448_v23 = vpop.f32.mrf.mxu1  ;;  %1745 = vmatprep.subr.bf16.mxu0 %v3864_v3 }
 0x148   : > { %v1457_v42 = vadd.f32 %v1453_v51, %v4473_v60  ;;  %v1454_v35 = vadd.f32 %v1407_v49, %v1320_v36  ;;  %v1459_v44 = vadd.f32 %v1455_v54, %v4534_v40  ;;  %v1456_v34 = vadd.f32 %v1448_v23, %v1361_v10 }
 0x149   : > { %v1409_v21 = vpop.f32.mrf.mxu0  ;;  %v1450_v19 = vpop.f32.mrf.mxu1  ;;  %v896_v36 = vmax.f32 %v888_v50, 0.0  ;;  %v889_v10 = vadd.f32 %v4542_v63, %v4487_v41  ;;  %v1073_v51 = vadd.f32 %v4517_v5, %v4503_v55  ;;  %v2335_v41 = vshll.u32 %v4493_v48, 16 }
 0x14a   : > { %v1461_v37 = vmax.f32 %v1457_v42, 0.0  ;;  %v1458_v38 = vadd.f32 %v1454_v35, %v4478_v1  ;;  %1746 = vmatpush1.bf16.msra.mxu0 %v4421_v29  ;;  %v1463_v56 = vmax.f32 %v1459_v44, 0.0  ;;  %v1460_v6 = vadd.f32 %v1456_v34, %v4542_v63 }
 0x14b   : > { %1759 = vmatprep.subr.bf16.mxu0 %v3864_v3  ;;  %v1410_v23 = vpop.f32.mrf.mxu0  ;;  %v1451_v62 = vpop.f32.mrf.mxu1  ;;  %v2501_v55 = vpack.c.bf16 %v896_v36, %v4569_v46  ;;  %v897_v5 = vmax.f32 %v889_v10, 0.0  ;;  %v1183_v42 = vadd.f32 %v1175_v59, %v4478_v1  ;;  %v1176_v35 = vadd.f32 %v4556_v12, %v1073_v51 }
 0x14c   : > { %v4627_v13 = vpack.c.bf16 %v1461_v37, %v1461_v37  ;;  %v1462_v8 = vmax.f32 %v1458_v38, 0.0  ;;  %v2205_v54 = vpack.c.bf16 %v1463_v56, %v1463_v56  ;;  %v1464_v49 = vmax.f32 %v1460_v6, 0.0 }
 0x14d   : > { %v2342_v60 = vshll.u32 %v4497_v52, 16  ;;  %v1190_v44 = vmax.f32 %v1182_v9, 0.0  ;;  %v2337_v46 = vrot.slane %v2335_v41, 1  ;;  %v2559_v58 = vpack.c.bf16 %v897_v5, %v4594_v2 }
 0x14e   : > { %v4635_v11 = vpack.c.bf16 %v1462_v8, %v1462_v8  ;;  %2155 = vrot.lane.b32.xlu0 %v4627_v13, %s3865_s22  ;;  %1760 = vmatpush2.bf16.msra.mxu0 %v4435_v31  ;;  %v2257_v34 = vpack.c.bf16 %v1464_v49, %v1464_v49  ;;  %v2333_v1 = vshrl.u32 %v4493_v48, 16  ;;  %v2505_v7 = vshll.u32 %v2501_v55, 16 }
 0x14f   : > { %1761 = vmatprep.subr.bf16.mxu0 %v3864_v3  ;;  %v1191_v12 = vmax.f32 %v1183_v42, 0.0  ;;  %v1184_v50 = vadd.f32 %v1176_v35, %v4534_v40  ;;  %v2344_v21 = vrot.slane %v2342_v60, 1  ;;  %v2638_v19 = vpack.c.bf16 %v1190_v44, %v4544_v53 }
 0x150   : > { %2157 = vrot.lane.b32.xlu1 %v4635_v11, %s3865_s22  ;;  %v4663_v37 = vor.u32 %v2337_v46, %v2333_v1  ;;  %v2340_v38 = vshrl.u32 %v4497_v52, 16  ;;  %v2503_v2 = vshrl.u32 %v2501_v55, 16  ;;  %v2507_v4 = vrot.slane %v2505_v7, 1 }
 0x151   : > { %v2563_v48 = vshll.u32 %v2559_v58, 16  ;;  %v2639_v61 = vpack.c.bf16 %v1191_v12, %v4559_v57  ;;  %v1192_v23 = vmax.f32 %v1184_v50, 0.0  ;;  %v1185_v40 = vadd.f32 %v1177_v47, %v4542_v63 }
 0x152   : > { %2207 = vrot.lane.b32.xlu0 %v4635_v11, %s3866_s23  ;;  %1762 = vmatpush2.bf16.msra.mxu0 %v4449_v33  ;;  %v4670_v45 = vor.u32 %v2344_v21, %v2340_v38  ;;  %v2643_v53 = vshll.u32 %v2638_v19, 16  ;;  %v2561_v62 = vshrl.u32 %v2559_v58, 16  ;;  %v2508_v57 = vor.u32 %v2507_v4, %v2503_v2  ;;  %v5352_v2 = vld [vmem:[#allocation5_spill] sm:$0xff]  ;;  %v5353_v4 = vld [vmem:[#allocation6_spill] sm:$0xff] }
 0x153   : > { %1834 = vmatprep.subr.bf16.mxu0 %v3864_v3  ;;  %v2565_v8 = vrot.slane %v2563_v48, 1  ;;  %v2809_v52 = vpack.c.bf16 %v1192_v23, %v4546_v0  ;;  %v1193_v56 = vmax.f32 %v1185_v40, 0.0  ;;  %v2650_v6 = vshll.u32 %v2639_v61, 16  ;;  %v5354_v48 = vld [vmem:[#allocation7_spill] sm:$0xff]  ;;  %v4813_v23 = vld [vmem:[%s5334_s2 + $0xb8] sm:$0xff]  }
 0x154   : > { %2209 = vrot.lane.b32.xlu1 %v2205_v54, %s3866_s23  ;;  %v2645_v63 = vrot.slane %v2643_v53, 1  ;;  %v2641_v51 = vshrl.u32 %v2638_v19, 16 }
 0x155   : > { %v2566_v36 = vor.u32 %v2565_v8, %v2561_v62  ;;  %v2867_v10 = vpack.c.bf16 %v1193_v56, %v4574_v43  ;;  %v2652_v59 = vrot.slane %v2650_v6, 1  ;;  %v2813_v9 = vshll.u32 %v2809_v52, 16  ;;  %v4865_v56 = vld [vmem:[%s5334_s2 + $0xe0] sm:$0xff]  }
 0x156   : > { %2259 = vrot.lane.b32.xlu0 %v2205_v54, %s3867_s24  ;;  %v4681_v0 = vor.u32 %v2645_v63, %v2641_v51  ;;  %v2648_v54 = vshrl.u32 %v2639_v61, 16  ;;  %v2811_v41 = vshrl.u32 %v2809_v52, 16  ;;  %v4804_v61 = vld [vmem:[%s5334_s2 + $0xc0] sm:$0xff]  }
 0x157   : > { %v2815_v55 = vrot.slane %v2813_v9, 1  ;;  %v2871_v5 = vshll.u32 %v2867_v10, 16  ;;  %v2869_v39 = vshrl.u32 %v2867_v10, 16  ;;  %v4931_v9 = vld [vmem:[%s5334_s2 + $0x120] sm:$0xff]  }
 0x158   : > { %2261 = vrot.lane.b32.xlu1 %v2257_v34, %s3867_s24  ;;  %v4685_v49 = vor.u32 %v2652_v59, %v2648_v54  ;;  %v4941_v54 = vld [vmem:[%s5334_s2 + $0x118] sm:$0xff]  }
 0x159   : > { %v2816_v43 = vor.u32 %v2815_v55, %v2811_v41  ;;  %v2873_v42 = vrot.slane %v2871_v5, 1  ;;  %v4950_v41 = vld [vmem:[%s5334_s2 + $0x110] sm:$0xff]   ;;  %v4959_v55 = vld [vmem:[%s5334_s2 + $0x108] sm:$0xff]   ;;  %v4968_v5 = vld [vmem:[%s5334_s2 + $0x100] sm:$0xff]  }
 0x15a   : > { %2451 = vrot.lane.b32.xlu0 %v4663_v37, %s3865_s22 }
 0x15b   : > { %v2874_v35 = vor.u32 %v2873_v42, %v2869_v39  ;;  %v4986_v39 = vld [vmem:[%s5334_s2 + $0xf0] sm:$0xff]  }
 0x15c   : > { %2453 = vrot.lane.b32.xlu1 %v4670_v45, %s3865_s22 }
 0x15e   : > { %2509 = vrot.lane.b32.xlu0 %v4670_v45, %s3866_s23 }
 0x160   : > { %2511 = vrot.lane.b32.xlu1 %v2508_v57, %s3866_s23 }
 0x162   : > { %2567 = vrot.lane.b32.xlu0 %v2508_v57, %s3867_s24 }
 0x164   : > { %2569 = vrot.lane.b32.xlu1 %v2566_v36, %s3867_s24 }
 0x166   : > { %2759 = vrot.lane.b32.xlu0 %v4681_v0, %s3865_s22 }
 0x168   : > { %2761 = vrot.lane.b32.xlu1 %v4685_v49, %s3865_s22  ;;  %s3786_s22 = scalar_lea.vmem %s3211_s26, 128 }
 0x169   : > { %p3787_p12 = scmp.ne.s32.totalorder %s3211_s26, %s3786_s22 }
 0x16a   : > { %2817 = vrot.lane.b32.xlu0 %v4685_v49, %s3866_s23 }
 0x16b   : > { %p3788_p13 = pnand %p3787_p12, %p3956_p4 }
 0x16c   : > { %2819 = vrot.lane.b32.xlu1 %v2816_v43, %s3866_s23  ;;  %s3870_s23 = smov [#allocation2]  }
 0x16d   : > { %p3789_p0 = pneg %p3788_p13 }
 0x16e   : > { %2875 = vrot.lane.b32.xlu0 %v2816_v43, %s3867_s24  ;;  %v4977_v43 = vld [vmem:[%s5334_s2 + $0xf8] sm:$0xff]  }
 0x170   : > { %2877 = vrot.lane.b32.xlu1 %v2874_v35, %s3867_s24  ;;  %s3790_s24 = sshll.u32 %s3870_s23, 4  ;;  %s3791_s24 = int_to_ptr.vmem [resolvable:$false] %s3790_s24 }
 0x171   : > { %s3792_s30 = scalar_lea.vmem %s3791_s24, 256  ;;  %p3793_p1 = scmp.lt.s32.totalorder %s3211_s26, %s3791_s24 }
 0x172   : > { %p3794_p2 = scmp.lt.s32.totalorder %s3792_s30, %s3786_s22 }
 0x174   : > { %p3795_p3 = por %p3794_p2, %p3793_p1 }
 0x176   : > { %p3796_p5 = pnand %p3795_p3, %p3789_p0 }
 0x178   : > { %v1774_v60 = vpop.permute.xlu1 %1773 }
 0x17c   : > { %v1776_v44 = vpop.permute.xlu1 %1775 }
 0x17d   : > { %v1777_v34 = vsel %vm1572_vm2, %v1774_v60, %v1776_v44  ;;  %3437 = vmatprep.mubr.msk.bf16.mxu1 %vm1572_vm2, %v1776_v44  ;;  %v4995_v60 = vld [vmem:[%s5334_s2 + $0x138] sm:$0xff]  }
 0x17e   : > { %1815 = vmatmul.mubr.bf16.vlgmr.msra.gmra.mxu1 %v1777_v34 }
 0x17f   : > { %1885 = vmatpush1.bf16.msra.mxu1 %v4314_v14 }
 0x180   : > { %1886 = vmatprep.subr.bf16.mxu1 %v3864_v3 }
 0x183   : > { %1887 = vmatpush1.bf16.msra.mxu1 %v4329_v16 }
 0x184   : > { %1888 = vmatprep.subr.bf16.mxu1 %v3864_v3 }
 0x187   : > { %1889 = vmatpush1.bf16.msra.mxu1 %v4343_v18 }
 0x188   : > { %1890 = vmatprep.subr.bf16.mxu1 %v3864_v3 }
 0x18b   : > { %1891 = vmatpush1.bf16.msra.mxu1 %v4357_v20 }
 0x18c   : > { %1892 = vmatprep.subr.bf16.mxu1 %v3864_v3 }
 0x18f   : > { %1893 = vmatpush1.bf16.msra.mxu1 %v4371_v22 }
 0x190   : > { %1894 = vmatprep.subr.bf16.mxu1 %v3864_v3 }
 0x193   : > { %1895 = vmatpush1.bf16.msra.mxu1 %v4385_v24 }
 0x194   : > { %1896 = vmatprep.subr.bf16.mxu1 %v3864_v3 }
 0x197   : > { %1897 = vmatpush1.bf16.msra.mxu1 %v4399_v26 }
 0x198   : > { %1898 = vmatprep.subr.bf16.mxu1 %v3864_v3 }
 0x19b   : > { %1899 = vmatpush1.bf16.msra.mxu1 %v4413_v28 }
 0x19c   : > { %v1722_v46 = vpop.permute.xlu0 %1721  ;;  %1912 = vmatprep.subr.bf16.mxu1 %v3864_v3 }
 0x19d   : > { %v1827_v58 = vpop.permute.xlu1 %1826 }
 0x19f   : > { %1913 = vmatpush2.bf16.msra.mxu1 %v4427_v30 }
 0x1a0   : > { %v1724_v1 = vpop.permute.xlu0 %1723  ;;  %1914 = vmatprep.subr.bf16.mxu1 %v3864_v3 }
 0x1a1   : > { %v1726_v7 = vsel %vm1572_vm2, %v1722_v46, %v1724_v1  ;;  %v1878_v12 = vpop.permute.xlu1 %1877  ;;  %3436 = vmatprep.mubr.msk.bf16.mxu0 %vm1572_vm2, %v1724_v1 }
 0x1a2   : > { %3439 = vmatprep.mubr.msk.bf16.mxu1 %vm1572_vm2, %v1878_v12  ;;  %1764 = vmatmul.mubr.bf16.vlgmr.msra.gmra.mxu0 %v1726_v7 }
 0x1a3   : > { %1835 = vmatpush1.bf16.msra.mxu0 %v4321_v15  ;;  %1915 = vmatpush2.bf16.msra.mxu1 %v4441_v32 }
 0x1a4   : > { %v1825_v50 = vpop.permute.xlu0 %1824  ;;  %1836 = vmatprep.subr.bf16.mxu0 %v3864_v3  ;;  %1986 = vmatprep.subr.bf16.mxu1 %v3864_v3 }
 0x1a5   : > { %v4721_v47 = vpop.permute.xlu1 %1928  ;;  %3438 = vmatprep.mubr.msk.bf16.mxu0 %vm1572_vm2, %v1827_v58 }
 0x1a7   : > { %1837 = vmatpush1.bf16.msra.mxu0 %v4337_v17 }
 0x1a8   : > { %v1876_v21 = vpop.permute.xlu0 %1875  ;;  %1838 = vmatprep.subr.bf16.mxu0 %v3864_v3 }
 0x1a9   : > { %v1879_v19 = vsel %vm1828_vm3, %v1876_v21, %v1878_v12  ;;  %v1980_v38 = vpop.permute.xlu1 %1979 }
 0x1aa   : > { %1917 = vmatmul.mubr.bf16.vlgmr.msra.gmra.mxu1 %v1879_v19 }
 0x1ab   : > { %1839 = vmatpush1.bf16.msra.mxu0 %v5352_v2  ;;  %1987 = vmatpush1.bf16.msra.mxu1 %v4314_v14  ;;  %v1829_v14 = vsel %vm1828_vm3, %v1825_v50, %v1827_v58  ;;  %v5008_v58 = vld [vmem:[%s5334_s2 + $0x130] sm:$0xff]  }
 0x1ac   : > { %3441 = vmatprep.mubr.msk.bf16.mxu1 %vm1572_vm2, %v1980_v38  ;;  %1840 = vmatprep.subr.bf16.mxu0 %v3864_v3 }
 0x1ad   : > { %1988 = vmatprep.subr.bf16.mxu1 %v3864_v3 }
 0x1af   : > { %1841 = vmatpush1.bf16.msra.mxu0 %v5353_v4  ;;  %1989 = vmatpush1.bf16.msra.mxu1 %v4329_v16  ;;  %v4761_v16 = vpop.permute.xlu0 %1926 }
 0x1b0   : > { %1842 = vmatprep.subr.bf16.mxu0 %v3864_v3  ;;  %1990 = vmatprep.subr.bf16.mxu1 %v3864_v3  ;;  %v1931_v8 = vsel %vm1930_vm4, %v4761_v16, %v4721_v47  ;;  %v5068_v16 = vld [vmem:[%s5334_s2 + $0x178] sm:$0xff]  }
 0x1b3   : > { %1843 = vmatpush1.bf16.msra.mxu0 %v5354_v48  ;;  %1991 = vmatpush1.bf16.msra.mxu1 %v4343_v18 }
 0x1b4   : > { %1844 = vmatprep.subr.bf16.mxu0 %v3864_v3  ;;  %1992 = vmatprep.subr.bf16.mxu1 %v3864_v3 }
 0x1b7   : > { %1845 = vmatpush1.bf16.msra.mxu0 %v4393_v25  ;;  %1993 = vmatpush1.bf16.msra.mxu1 %v4357_v20 }
 0x1b8   : > { %1846 = vmatprep.subr.bf16.mxu0 %v3864_v3  ;;  %1994 = vmatprep.subr.bf16.mxu1 %v3864_v3 }
 0x1bb   : > { %1847 = vmatpush1.bf16.msra.mxu0 %v4407_v27  ;;  %1995 = vmatpush1.bf16.msra.mxu1 %v4371_v22 }
 0x1bc   : > { %1848 = vmatprep.subr.bf16.mxu0 %v3864_v3  ;;  %1996 = vmatprep.subr.bf16.mxu1 %v3864_v3 }
 0x1bf   : > { %1849 = vmatpush1.bf16.msra.mxu0 %v4421_v29  ;;  %1997 = vmatpush1.bf16.msra.mxu1 %v4385_v24  ;;  %v1978_v24 = vpop.permute.xlu0 %1977 }
 0x1c0   : > { %1862 = vmatprep.subr.bf16.mxu0 %v3864_v3  ;;  %1998 = vmatprep.subr.bf16.mxu1 %v3864_v3 }
 0x1c3   : > { %1863 = vmatpush2.bf16.msra.mxu0 %v4435_v31  ;;  %1999 = vmatpush1.bf16.msra.mxu1 %v4399_v26  ;;  %v2156_v6 = vpop.permute.xlu0 %2155 }
 0x1c4   : > { %1864 = vmatprep.subr.bf16.mxu0 %v3864_v3  ;;  %2000 = vmatprep.subr.bf16.mxu1 %v3864_v3 }
 0x1c7   : > { %1865 = vmatpush2.bf16.msra.mxu0 %v4449_v33  ;;  %2001 = vmatpush1.bf16.msra.mxu1 %v4413_v28  ;;  %v1981_v28 = vsel %vm1930_vm4, %v1978_v24, %v1980_v38  ;;  %v2208_v36 = vpop.permute.xlu0 %2207  ;;  %v5081_v24 = vld [vmem:[%s5334_s2 + $0x170] sm:$0xff]  }
 0x1c8   : > { %1936 = vmatprep.subr.bf16.mxu0 %v3864_v3  ;;  %2014 = vmatprep.subr.bf16.mxu1 %v3864_v3 }
 0x1c9   : > { %v1713_v18 = vpop.f32.mrf.mxu1 }
 0x1ca   : > { %1867 = vmatmul.mubr.bf16.vlgmr.msra.gmra.mxu0 %v1829_v14 }
 0x1cb   : > { %1937 = vmatpush1.bf16.msra.mxu0 %v4321_v15  ;;  %3440 = vmatprep.mubr.msk.bf16.mxu0 %vm1572_vm2, %v4721_v47  ;;  %v1715_v20 = vpop.f32.mrf.mxu1  ;;  %v4775_v15 = vld [vmem:[%s5334_s2 + $0xd8] sm:$0xff]   ;;  %v2260_v10 = vpop.permute.xlu0 %2259 }
 0x1cc   : > { %2015 = vmatpush2.bf16.msra.mxu1 %v4427_v30  ;;  %1938 = vmatprep.subr.bf16.mxu0 %v3864_v3  ;;  %v2158_v30 = vpop.permute.xlu1 %2157 }
 0x1cd   : > { %v1716_v22 = vpop.f32.mrf.mxu1  ;;  %2016 = vmatprep.subr.bf16.mxu1 %v3864_v3  ;;  %v2159_v63 = vsel %vm1572_vm2, %v2156_v6, %v2158_v30 }
 0x1cf   : > { %1939 = vmatpush1.bf16.msra.mxu0 %v4337_v17  ;;  %v1717_v26 = vpop.f32.mrf.mxu1  ;;  %v4785_v17 = vld [vmem:[%s5334_s2 + $0xd0] sm:$0xff]  }
 0x1d0   : > { %2017 = vmatpush2.bf16.msra.mxu1 %v4441_v32  ;;  %1940 = vmatprep.subr.bf16.mxu0 %v3864_v3  ;;  %v4795_v32 = vld [vmem:[%s5334_s2 + $0xc8] sm:$0xff]   ;;  %v4868_v57 = vpop.permute.xlu1 %2209 }
 0x1d1   : > { %2164 = vmatprep.subr.bf16.mxu1 %v3864_v3  ;;  %v2211_v44 = vsel %vm1828_vm3, %v2208_v36, %v4868_v57  ;;  %v5091_v26 = vld [vmem:[%s5334_s2 + $0x168] sm:$0xff]  }
 0x1d3   : > { %2019 = vmatmul.mubr.bf16.vlgmr.msra.gmra.mxu1 %v1981_v28  ;;  %1941 = vmatpush1.bf16.msra.mxu0 %v5352_v2  ;;  %v5109_v28 = vld [vmem:[%s5334_s2 + $0x158] sm:$0xff]  }
 0x1d4   : > { %2165 = vmatpush1.bf16.msra.mxu1 %v4775_v15  ;;  %1942 = vmatprep.subr.bf16.mxu0 %v3864_v3 }
 0x1d5   : > { %2166 = vmatprep.subr.bf16.mxu1 %v3864_v3  ;;  %3473 = vmatprep.mubr.msk.bf16.mxu1 %vm1572_vm2, %v2158_v30  ;;  %v5118_v30 = vld [vmem:[%s5334_s2 + $0x150] sm:$0xff]  }
 0x1d7   : > { %1943 = vmatpush1.bf16.msra.mxu0 %v5353_v4 }
 0x1d8   : > { %2167 = vmatpush1.bf16.msra.mxu1 %v4785_v17  ;;  %1944 = vmatprep.subr.bf16.mxu0 %v3864_v3 }
 0x1d9   : > { %2168 = vmatprep.subr.bf16.mxu1 %v3864_v3 }
 0x1db   : > { %1945 = vmatpush1.bf16.msra.mxu0 %v5354_v48 }
 0x1dc   : > { %2169 = vmatpush1.bf16.msra.mxu1 %v4795_v32  ;;  %1946 = vmatprep.subr.bf16.mxu0 %v3864_v3 }
 0x1dd   : > { %2170 = vmatprep.subr.bf16.mxu1 %v3864_v3 }
 0x1df   : > { %1947 = vmatpush1.bf16.msra.mxu0 %v4393_v25  ;;  %v4822_v25 = vld [vmem:[%s5334_s2 + $0xb0] sm:$0xff]  }
 0x1e0   : > { %2171 = vmatpush1.bf16.msra.mxu1 %v4804_v61  ;;  %1948 = vmatprep.subr.bf16.mxu0 %v3864_v3 }
 0x1e1   : > { %2172 = vmatprep.subr.bf16.mxu1 %v3864_v3 }
 0x1e3   : > { %1949 = vmatpush1.bf16.msra.mxu0 %v4407_v27  ;;  %v4831_v27 = vld [vmem:[%s5334_s2 + $0xa8] sm:$0xff]  }
 0x1e4   : > { %2173 = vmatpush1.bf16.msra.mxu1 %v4813_v23  ;;  %1950 = vmatprep.subr.bf16.mxu0 %v3864_v3 }
 0x1e5   : > { %2174 = vmatprep.subr.bf16.mxu1 %v3864_v3 }
 0x1e7   : > { %1951 = vmatpush1.bf16.msra.mxu0 %v4421_v29  ;;  %v4840_v29 = vld [vmem:[%s5334_s2 + $0xa0] sm:$0xff]  }
 0x1e8   : > { %2175 = vmatpush1.bf16.msra.mxu1 %v4822_v25  ;;  %1964 = vmatprep.subr.bf16.mxu0 %v3864_v3 }
 0x1e9   : > { %2176 = vmatprep.subr.bf16.mxu1 %v3864_v3 }
 0x1eb   : > { %1965 = vmatpush2.bf16.msra.mxu0 %v4435_v31  ;;  %v4851_v31 = vld [vmem:[%s5334_s2 + $0xe8] sm:$0xff]  }
 0x1ec   : > { %2177 = vmatpush1.bf16.msra.mxu1 %v4831_v27  ;;  %1966 = vmatprep.subr.bf16.mxu0 %v3864_v3 }
 0x1ed   : > { %v1610_v40 = vpop.f32.mrf.mxu0  ;;  %2178 = vmatprep.subr.bf16.mxu1 %v3864_v3 }
 0x1ee   : > { %v4843_v53 = vadd.f32 %v1713_v18, %v1610_v40  ;;  %v5147_v40 = vld [vmem:[%s5334_s2 + $0x188] sm:$0xff]  }
 0x1ef   : > { %1967 = vmatpush2.bf16.msra.mxu0 %v4449_v33  ;;  %v1612_v62 = vpop.f32.mrf.mxu0 }
 0x1f0   : > { %2179 = vmatpush1.bf16.msra.mxu1 %v4840_v29  ;;  %2112 = vmatprep.subr.bf16.mxu0 %v3864_v3 }
 0x1f1   : > { %v1613_v52 = vpop.f32.mrf.mxu0  ;;  %2192 = vmatprep.subr.bf16.mxu1 %v3864_v3 }
 0x1f2   : > { %1969 = vmatmul.mubr.bf16.vlgmr.msra.gmra.mxu0 %v1931_v8  ;;  %v5161_v8 = vld [vmem:[%s5334_s2 + $0x180] sm:$0xff]  }
 0x1f3   : > { %2113 = vmatpush1.bf16.msra.mxu0 %v4775_v15  ;;  %3472 = vmatprep.mubr.msk.bf16.mxu0 %vm1572_vm2, %v4635_v11  ;;  %v1614_v33 = vpop.f32.mrf.mxu0  ;;  %v2262_v11 = vpop.permute.xlu1 %2261 }
 0x1f4   : > { %2193 = vmatpush2.bf16.msra.mxu1 %v4851_v31  ;;  %2114 = vmatprep.subr.bf16.mxu0 %v3864_v3  ;;  %v2263_v51 = vsel %vm1930_vm4, %v2260_v10, %v2262_v11 }
 0x1f5   : > { %2194 = vmatprep.subr.bf16.mxu1 %v3864_v3 }
 0x1f7   : > { %2115 = vmatpush1.bf16.msra.mxu0 %v4785_v17  ;;  %v2454_v59 = vpop.permute.xlu1 %2453 }
 0x1f8   : > { %2195 = vmatpush2.bf16.msra.mxu1 %v4865_v56  ;;  %2116 = vmatprep.subr.bf16.mxu0 %v3864_v3 }
 0x1f9   : > { %2268 = vmatprep.subr.bf16.mxu1 %v3864_v3 }
 0x1fb   : > { %2197 = vmatmul.mubr.bf16.vlgmr.msra.gmra.mxu1 %v2159_v63  ;;  %2117 = vmatpush1.bf16.msra.mxu0 %v4795_v32  ;;  %v5010_v1 = vpop.permute.xlu1 %2511 }
 0x1fc   : > { %2269 = vmatpush1.bf16.msra.mxu1 %v4775_v15  ;;  %2118 = vmatprep.subr.bf16.mxu0 %v3864_v3 }
 0x1fd   : > { %2270 = vmatprep.subr.bf16.mxu1 %v3864_v3  ;;  %3475 = vmatprep.mubr.msk.bf16.mxu1 %vm1572_vm2, %v2262_v11 }
 0x1ff   : > { %2119 = vmatpush1.bf16.msra.mxu0 %v4804_v61  ;;  %v2570_v12 = vpop.permute.xlu1 %2569 }
 0x200   : > { %2271 = vmatpush1.bf16.msra.mxu1 %v4785_v17  ;;  %2120 = vmatprep.subr.bf16.mxu0 %v3864_v3 }
 0x201   : > { %2272 = vmatprep.subr.bf16.mxu1 %v3864_v3 }
 0x203   : > { %2121 = vmatpush1.bf16.msra.mxu0 %v4813_v23  ;;  %v5072_v22 = vpop.permute.xlu1 %2761 }
 0x204   : > { %2273 = vmatpush1.bf16.msra.mxu1 %v4795_v32  ;;  %2122 = vmatprep.subr.bf16.mxu0 %v3864_v3 }
 0x205   : > { %2274 = vmatprep.subr.bf16.mxu1 %v3864_v3 }
 0x207   : > { %2123 = vmatpush1.bf16.msra.mxu0 %v4822_v25  ;;  %v5163_v52 = vpop.permute.xlu1 %2819 }
 0x208   : > { %2275 = vmatpush1.bf16.msra.mxu1 %v4804_v61  ;;  %2124 = vmatprep.subr.bf16.mxu0 %v3864_v3 }
 0x209   : > { %2276 = vmatprep.subr.bf16.mxu1 %v3864_v3 }
 0x20b   : > { %2125 = vmatpush1.bf16.msra.mxu0 %v4831_v27  ;;  %v2878_v63 = vpop.permute.xlu1 %2877 }
 0x20c   : > { %2277 = vmatpush1.bf16.msra.mxu1 %v4813_v23  ;;  %2126 = vmatprep.subr.bf16.mxu0 %v3864_v3 }
 0x20d   : > { %2278 = vmatprep.subr.bf16.mxu1 %v3864_v3 }
 0x20f   : > { %2127 = vmatpush1.bf16.msra.mxu0 %v4840_v29 }
 0x210   : > { %2279 = vmatpush1.bf16.msra.mxu1 %v4822_v25  ;;  %2140 = vmatprep.subr.bf16.mxu0 %v3864_v3 }
 0x211   : > { %2280 = vmatprep.subr.bf16.mxu1 %v3864_v3 }
 0x213   : > { %2141 = vmatpush2.bf16.msra.mxu0 %v4851_v31 }
 0x214   : > { %2281 = vmatpush1.bf16.msra.mxu1 %v4831_v27  ;;  %2142 = vmatprep.subr.bf16.mxu0 %v3864_v3 }
 0x215   : > { %2282 = vmatprep.subr.bf16.mxu1 %v3864_v3 }
 0x217   : > { %2143 = vmatpush2.bf16.msra.mxu0 %v4865_v56 }
 0x218   : > { %2283 = vmatpush1.bf16.msra.mxu1 %v4840_v29  ;;  %2216 = vmatprep.subr.bf16.mxu0 %v3864_v3 }
 0x219   : > { %2296 = vmatprep.subr.bf16.mxu1 %v3864_v3 }
 0x21a   : > { %2145 = vmatmul.mubr.bf16.vlgmr.msra.gmra.mxu0 %v4627_v13  ;;  %v4922_v13 = vld [vmem:[%s5334_s2 + $0x128] sm:$0xff]  }
 0x21b   : > { %2217 = vmatpush1.bf16.msra.mxu0 %v4775_v15  ;;  %3474 = vmatprep.mubr.msk.bf16.mxu0 %vm1572_vm2, %v4868_v57  ;;  %v5100_v15 = vld [vmem:[%s5334_s2 + $0x160] sm:$0xff]  }
 0x21c   : > { %2297 = vmatpush2.bf16.msra.mxu1 %v4851_v31  ;;  %2218 = vmatprep.subr.bf16.mxu0 %v3864_v3 }
 0x21d   : > { %2298 = vmatprep.subr.bf16.mxu1 %v3864_v3 }
 0x21f   : > { %2219 = vmatpush1.bf16.msra.mxu0 %v4785_v17  ;;  %v5127_v17 = vld [vmem:[%s5334_s2 + $0x148] sm:$0xff]  }
 0x220   : > { %2299 = vmatpush2.bf16.msra.mxu1 %v4865_v56  ;;  %2220 = vmatprep.subr.bf16.mxu0 %v3864_v3 }
 0x221   : > { %2460 = vmatprep.subr.bf16.mxu1 %v3864_v3 }
 0x223   : > { %2301 = vmatmul.mubr.bf16.vlgmr.msra.gmra.mxu1 %v2263_v51  ;;  %2221 = vmatpush1.bf16.msra.mxu0 %v4795_v32 }
 0x224   : > { %2461 = vmatpush1.bf16.msra.mxu1 %v4922_v13  ;;  %3507 = vmatprep.mubr.msk.bf16.mxu1 %vm1572_vm2, %v2454_v59 }
 0x225   : > { %2222 = vmatprep.subr.bf16.mxu0 %v3864_v3  ;;  %2462 = vmatprep.subr.bf16.mxu1 %v3864_v3 }
 0x227   : > { %2223 = vmatpush1.bf16.msra.mxu0 %v4804_v61 }
 0x228   : > { %2463 = vmatpush1.bf16.msra.mxu1 %v4931_v9  ;;  %2224 = vmatprep.subr.bf16.mxu0 %v3864_v3 }
 0x229   : > { %2464 = vmatprep.subr.bf16.mxu1 %v3864_v3 }
 0x22b   : > { %2225 = vmatpush1.bf16.msra.mxu0 %v4813_v23 }
 0x22c   : > { %2465 = vmatpush1.bf16.msra.mxu1 %v4941_v54  ;;  %2226 = vmatprep.subr.bf16.mxu0 %v3864_v3 }
 0x22d   : > { %2466 = vmatprep.subr.bf16.mxu1 %v3864_v3 }
 0x22f   : > { %2227 = vmatpush1.bf16.msra.mxu0 %v4822_v25  ;;  %v5138_v25 = vld [vmem:[%s5334_s2 + $0x140] sm:$0xff]  }
 0x230   : > { %2467 = vmatpush1.bf16.msra.mxu1 %v4950_v41  ;;  %2228 = vmatprep.subr.bf16.mxu0 %v3864_v3 }
 0x231   : > { %2468 = vmatprep.subr.bf16.mxu1 %v3864_v3 }
 0x233   : > { %2229 = vmatpush1.bf16.msra.mxu0 %v4831_v27 }
 0x234   : > { %2469 = vmatpush1.bf16.msra.mxu1 %v4959_v55  ;;  %2230 = vmatprep.subr.bf16.mxu0 %v3864_v3 }
 0x235   : > { %2470 = vmatprep.subr.bf16.mxu1 %v3864_v3 }
 0x237   : > { %2231 = vmatpush1.bf16.msra.mxu0 %v4840_v29 }
 0x238   : > { %2471 = vmatpush1.bf16.msra.mxu1 %v4968_v5  ;;  %2244 = vmatprep.subr.bf16.mxu0 %v3864_v3 }
 0x239   : > { %2472 = vmatprep.subr.bf16.mxu1 %v3864_v3 }
 0x23b   : > { %2245 = vmatpush2.bf16.msra.mxu0 %v4851_v31 }
 0x23c   : > { %2473 = vmatpush1.bf16.msra.mxu1 %v4977_v43  ;;  %2246 = vmatprep.subr.bf16.mxu0 %v3864_v3 }
 0x23d   : > { %2474 = vmatprep.subr.bf16.mxu1 %v3864_v3 }
 0x23e   : > { %v1816_v42 = vpop.f32.mrf.mxu1 }
 0x23f   : > { %2247 = vmatpush2.bf16.msra.mxu0 %v4865_v56 }
 0x240   : > { %2475 = vmatpush1.bf16.msra.mxu1 %v4986_v39  ;;  %v1818_v35 = vpop.f32.mrf.mxu1  ;;  %2410 = vmatprep.subr.bf16.mxu0 %v3864_v3 }
 0x241   : > { %2488 = vmatprep.subr.bf16.mxu1 %v3864_v3 }
 0x242   : > { %2249 = vmatmul.mubr.bf16.vlgmr.msra.gmra.mxu0 %v2211_v44  ;;  %v1819_v34 = vpop.f32.mrf.mxu1 }
 0x243   : > { %2411 = vmatpush1.bf16.msra.mxu0 %v4922_v13  ;;  %3506 = vmatprep.mubr.msk.bf16.mxu0 %vm1572_vm2, %v4670_v45  ;;  %v2452_v45 = vpop.permute.xlu0 %2451  ;;  %v3778_v34 = vld [vmem:[%s5335_s3 + $0x18] sm:$0xff]  }
 0x244   : > { %2489 = vmatpush2.bf16.msra.mxu1 %v4995_v60  ;;  %v1820_v46 = vpop.f32.mrf.mxu1  ;;  %2412 = vmatprep.subr.bf16.mxu0 %v3864_v3  ;;  %v2455_v7 = vsel %vm1572_vm2, %v2452_v45, %v2454_v59 }
 0x245   : > { %2490 = vmatprep.subr.bf16.mxu1 %v3864_v3 }
 0x247   : > { %2413 = vmatpush1.bf16.msra.mxu0 %v4931_v9  ;;  %v5054_v4 = vpop.permute.xlu0 %2509 }
 0x248   : > { %2491 = vmatpush2.bf16.msra.mxu1 %v5008_v58  ;;  %2414 = vmatprep.subr.bf16.mxu0 %v3864_v3  ;;  %v2513_v62 = vsel %vm1828_vm3, %v5054_v4, %v5010_v1 }
 0x249   : > { %2576 = vmatprep.subr.bf16.mxu1 %v3864_v3 }
 0x24b   : > { %2493 = vmatmul.mubr.bf16.vlgmr.msra.gmra.mxu1 %v2455_v7  ;;  %2415 = vmatpush1.bf16.msra.mxu0 %v4941_v54  ;;  %v2568_v18 = vpop.permute.xlu0 %2567 }
 0x24c   : > { %2577 = vmatpush1.bf16.msra.mxu1 %v4922_v13  ;;  %3509 = vmatprep.mubr.msk.bf16.mxu1 %vm1572_vm2, %v2570_v12  ;;  %v2571_v20 = vsel %vm1930_vm4, %v2568_v18, %v2570_v12 }
 0x24d   : > { %2416 = vmatprep.subr.bf16.mxu0 %v3864_v3  ;;  %2578 = vmatprep.subr.bf16.mxu1 %v3864_v3 }
 0x24f   : > { %2417 = vmatpush1.bf16.msra.mxu0 %v4950_v41 }
 0x250   : > { %2579 = vmatpush1.bf16.msra.mxu1 %v4931_v9  ;;  %2418 = vmatprep.subr.bf16.mxu0 %v3864_v3 }
 0x251   : > { %2580 = vmatprep.subr.bf16.mxu1 %v3864_v3 }
 0x253   : > { %2419 = vmatpush1.bf16.msra.mxu0 %v4959_v55 }
 0x254   : > { %2581 = vmatpush1.bf16.msra.mxu1 %v4941_v54  ;;  %2420 = vmatprep.subr.bf16.mxu0 %v3864_v3 }
 0x255   : > { %2582 = vmatprep.subr.bf16.mxu1 %v3864_v3 }
 0x257   : > { %2421 = vmatpush1.bf16.msra.mxu0 %v4968_v5 }
 0x258   : > { %2583 = vmatpush1.bf16.msra.mxu1 %v4950_v41  ;;  %2422 = vmatprep.subr.bf16.mxu0 %v3864_v3 }
 0x259   : > { %2584 = vmatprep.subr.bf16.mxu1 %v3864_v3 }
 0x25b   : > { %2423 = vmatpush1.bf16.msra.mxu0 %v4977_v43 }
 0x25c   : > { %2585 = vmatpush1.bf16.msra.mxu1 %v4959_v55  ;;  %2424 = vmatprep.subr.bf16.mxu0 %v3864_v3 }
 0x25d   : > { %2586 = vmatprep.subr.bf16.mxu1 %v3864_v3 }
 0x25f   : > { %2425 = vmatpush1.bf16.msra.mxu0 %v4986_v39 }
 0x260   : > { %2587 = vmatpush1.bf16.msra.mxu1 %v4968_v5  ;;  %2438 = vmatprep.subr.bf16.mxu0 %v3864_v3 }
 0x261   : > { %2588 = vmatprep.subr.bf16.mxu1 %v3864_v3 }
 0x262   : > { %v1765_v50 = vpop.f32.mrf.mxu0 }
 0x263   : > { %v5043_v47 = vadd.f32 %v1816_v42, %v1765_v50  ;;  %2439 = vmatpush2.bf16.msra.mxu0 %v4995_v60  ;;  %v3780_v50 = vld [vmem:[%s5335_s3 + $0x8] sm:$0xff]  }
 0x264   : > { %2589 = vmatpush1.bf16.msra.mxu1 %v4977_v43  ;;  %v1767_v21 = vpop.f32.mrf.mxu0  ;;  %2440 = vmatprep.subr.bf16.mxu0 %v3864_v3 }
 0x265   : > { %2590 = vmatprep.subr.bf16.mxu1 %v3864_v3 }
 0x266   : > { %v1768_v19 = vpop.f32.mrf.mxu0 }
 0x267   : > { %2441 = vmatpush2.bf16.msra.mxu0 %v5008_v58 }
 0x268   : > { %2591 = vmatpush1.bf16.msra.mxu1 %v4986_v39  ;;  %v1769_v38 = vpop.f32.mrf.mxu0  ;;  %2518 = vmatprep.subr.bf16.mxu0 %v3864_v3 }
 0x269   : > { %2604 = vmatprep.subr.bf16.mxu1 %v3864_v3 }
 0x26a   : > { %2443 = vmatmul.mubr.bf16.vlgmr.msra.gmra.mxu0 %v4663_v37  ;;  %v1918_v2 = vpop.f32.mrf.mxu1 }
 0x26b   : > { %2519 = vmatpush1.bf16.msra.mxu0 %v4922_v13  ;;  %3508 = vmatprep.mubr.msk.bf16.mxu0 %vm1572_vm2, %v5010_v1 }
 0x26c   : > { %2605 = vmatpush2.bf16.msra.mxu1 %v4995_v60  ;;  %v1920_v48 = vpop.f32.mrf.mxu1  ;;  %2520 = vmatprep.subr.bf16.mxu0 %v3864_v3 }
 0x26d   : > { %2606 = vmatprep.subr.bf16.mxu1 %v3864_v3 }
 0x26e   : > { %v1921_v14 = vpop.f32.mrf.mxu1 }
 0x26f   : > { %2521 = vmatpush1.bf16.msra.mxu0 %v4931_v9 }
 0x270   : > { %2607 = vmatpush2.bf16.msra.mxu1 %v5008_v58  ;;  %v1922_v37 = vpop.f32.mrf.mxu1  ;;  %2522 = vmatprep.subr.bf16.mxu0 %v3864_v3 }
 0x271   : > { %2768 = vmatprep.subr.bf16.mxu1 %v3864_v3 }
 0x273   : > { %2609 = vmatmul.mubr.bf16.vlgmr.msra.gmra.mxu1 %v2571_v20  ;;  %2523 = vmatpush1.bf16.msra.mxu0 %v4941_v54 }
 0x274   : > { %2769 = vmatpush1.bf16.msra.mxu1 %v5068_v16  ;;  %3541 = vmatprep.mubr.msk.bf16.mxu1 %vm1572_vm2, %v5072_v22 }
 0x275   : > { %2524 = vmatprep.subr.bf16.mxu0 %v3864_v3  ;;  %2770 = vmatprep.subr.bf16.mxu1 %v3864_v3 }
 0x277   : > { %2525 = vmatpush1.bf16.msra.mxu0 %v4950_v41 }
 0x278   : > { %2771 = vmatpush1.bf16.msra.mxu1 %v5081_v24  ;;  %2526 = vmatprep.subr.bf16.mxu0 %v3864_v3 }
 0x279   : > { %2772 = vmatprep.subr.bf16.mxu1 %v3864_v3 }
 0x27b   : > { %2527 = vmatpush1.bf16.msra.mxu0 %v4959_v55 }
 0x27c   : > { %2773 = vmatpush1.bf16.msra.mxu1 %v5091_v26  ;;  %2528 = vmatprep.subr.bf16.mxu0 %v3864_v3 }
 0x27d   : > { %2774 = vmatprep.subr.bf16.mxu1 %v3864_v3 }
 0x27f   : > { %2529 = vmatpush1.bf16.msra.mxu0 %v4968_v5 }
 0x280   : > { %2775 = vmatpush1.bf16.msra.mxu1 %v5100_v15  ;;  %2530 = vmatprep.subr.bf16.mxu0 %v3864_v3 }
 0x281   : > { %2776 = vmatprep.subr.bf16.mxu1 %v3864_v3 }
 0x283   : > { %2531 = vmatpush1.bf16.msra.mxu0 %v4977_v43 }
 0x284   : > { %2777 = vmatpush1.bf16.msra.mxu1 %v5109_v28  ;;  %2532 = vmatprep.subr.bf16.mxu0 %v3864_v3 }
 0x285   : > { %2778 = vmatprep.subr.bf16.mxu1 %v3864_v3 }
 0x287   : > { %2533 = vmatpush1.bf16.msra.mxu0 %v4986_v39 }
 0x288   : > { %2779 = vmatpush1.bf16.msra.mxu1 %v5118_v30  ;;  %2546 = vmatprep.subr.bf16.mxu0 %v3864_v3 }
 0x289   : > { %2780 = vmatprep.subr.bf16.mxu1 %v3864_v3 }
 0x28a   : > { %v1868_v32 = vpop.f32.mrf.mxu0 }
 0x28b   : > { %v5130_v61 = vadd.f32 %v1918_v2, %v1868_v32  ;;  %2547 = vmatpush2.bf16.msra.mxu0 %v4995_v60  ;;  %v3868_v60 = vmov 0.0  }
 0x28c   : > { %2781 = vmatpush1.bf16.msra.mxu1 %v5127_v17  ;;  %v1870_v23 = vpop.f32.mrf.mxu0  ;;  %2548 = vmatprep.subr.bf16.mxu0 %v3864_v3 }
 0x28d   : > { %2782 = vmatprep.subr.bf16.mxu1 %v3864_v3 }
 0x28e   : > { %v1871_v27 = vpop.f32.mrf.mxu0 }
 0x28f   : > { %2549 = vmatpush2.bf16.msra.mxu0 %v5008_v58 }
 0x290   : > { %2783 = vmatpush1.bf16.msra.mxu1 %v5138_v25  ;;  %v1872_v29 = vpop.f32.mrf.mxu0  ;;  %2718 = vmatprep.subr.bf16.mxu0 %v3864_v3 }
 0x291   : > { %2796 = vmatprep.subr.bf16.mxu1 %v3864_v3 }
 0x292   : > { %2551 = vmatmul.mubr.bf16.vlgmr.msra.gmra.mxu0 %v2513_v62  ;;  %v3544_v62 = vld [vmem:[%s5337_s5] ss:$0 sm:$0xff] }
 0x293   : > { %v2020_v31 = vpop.f32.mrf.mxu1  ;;  %2719 = vmatpush1.bf16.msra.mxu0 %v5068_v16  ;;  %3540 = vmatprep.mubr.msk.bf16.mxu0 %vm1572_vm2, %v4685_v49  ;;  %v2760_v49 = vpop.permute.xlu0 %2759 }
 0x294   : > { %2797 = vmatpush2.bf16.msra.mxu1 %v5147_v40  ;;  %2720 = vmatprep.subr.bf16.mxu0 %v3864_v3  ;;  %v2763_v6 = vsel %vm1572_vm2, %v2760_v49, %v5072_v22 }
 0x295   : > { %v2022_v33 = vpop.f32.mrf.mxu1  ;;  %2798 = vmatprep.subr.bf16.mxu1 %v3864_v3 }
 0x297   : > { %v2023_v56 = vpop.f32.mrf.mxu1  ;;  %2721 = vmatpush1.bf16.msra.mxu0 %v5081_v24  ;;  %v2818_v59 = vpop.permute.xlu0 %2817 }
 0x298   : > { %2799 = vmatpush2.bf16.msra.mxu1 %v5161_v8  ;;  %2722 = vmatprep.subr.bf16.mxu0 %v3864_v3 }
 0x299   : > { %v2024_v57 = vpop.f32.mrf.mxu1  ;;  %2884 = vmatprep.subr.bf16.mxu1 %v3864_v3 }
 0x29b   : > { %2801 = vmatmul.mubr.bf16.vlgmr.msra.gmra.mxu1 %v2763_v6  ;;  %2723 = vmatpush1.bf16.msra.mxu0 %v5091_v26  ;;  %v2876_v55 = vpop.permute.xlu0 %2875  ;;  %v3784_v6 = vld [vmem:[%s5335_s3 + $0x28] sm:$0xff]  }
 0x29c   : > { %2885 = vmatpush1.bf16.msra.mxu1 %v5068_v16  ;;  %3543 = vmatprep.mubr.msk.bf16.mxu1 %vm1572_vm2, %v2878_v63  ;;  %v2879_v43 = vsel %vm1930_vm4, %v2876_v55, %v2878_v63 }
 0x29d   : > { %2724 = vmatprep.subr.bf16.mxu0 %v3864_v3  ;;  %2886 = vmatprep.subr.bf16.mxu1 %v3864_v3 }
 0x29f   : > { %2725 = vmatpush1.bf16.msra.mxu0 %v5100_v15 }
 0x2a0   : > { %2887 = vmatpush1.bf16.msra.mxu1 %v5081_v24  ;;  %2726 = vmatprep.subr.bf16.mxu0 %v3864_v3 }
 0x2a1   : > { %2888 = vmatprep.subr.bf16.mxu1 %v3864_v3 }
 0x2a3   : > { %2727 = vmatpush1.bf16.msra.mxu0 %v5109_v28 }
 0x2a4   : > { %2889 = vmatpush1.bf16.msra.mxu1 %v5091_v26  ;;  %2728 = vmatprep.subr.bf16.mxu0 %v3864_v3 }
 0x2a5   : > { %2890 = vmatprep.subr.bf16.mxu1 %v3864_v3 }
 0x2a7   : > { %2729 = vmatpush1.bf16.msra.mxu0 %v5118_v30 }
 0x2a8   : > { %2891 = vmatpush1.bf16.msra.mxu1 %v5100_v15  ;;  %2730 = vmatprep.subr.bf16.mxu0 %v3864_v3 }
 0x2a9   : > { %2892 = vmatprep.subr.bf16.mxu1 %v3864_v3 }
 0x2ab   : > { %2731 = vmatpush1.bf16.msra.mxu0 %v5127_v17 }
 0x2ac   : > { %2893 = vmatpush1.bf16.msra.mxu1 %v5109_v28  ;;  %2732 = vmatprep.subr.bf16.mxu0 %v3864_v3 }
 0x2ad   : > { %2894 = vmatprep.subr.bf16.mxu1 %v3864_v3 }
 0x2af   : > { %2733 = vmatpush1.bf16.msra.mxu0 %v5138_v25 }
 0x2b0   : > { %2895 = vmatpush1.bf16.msra.mxu1 %v5118_v30  ;;  %2746 = vmatprep.subr.bf16.mxu0 %v3864_v3 }
 0x2b1   : > { %2896 = vmatprep.subr.bf16.mxu1 %v3864_v3 }
 0x2b2   : > { %v1970_v11 = vpop.f32.mrf.mxu0 }
 0x2b3   : > { %v2021_v36 = vadd.f32 %v2020_v31, %v1970_v11  ;;  %2747 = vmatpush2.bf16.msra.mxu0 %v5147_v40  ;;  %v3785_v11 = vld [vmem:[%s5335_s3 + $0x20] sm:$0xff]  }
 0x2b4   : > { %2897 = vmatpush1.bf16.msra.mxu1 %v5127_v17  ;;  %v1972_v10 = vpop.f32.mrf.mxu0  ;;  %2748 = vmatprep.subr.bf16.mxu0 %v3864_v3 }
 0x2b5   : > { %2898 = vmatprep.subr.bf16.mxu1 %v3864_v3 }
 0x2b6   : > { %v1973_v51 = vpop.f32.mrf.mxu0 }
 0x2b7   : > { %2749 = vmatpush2.bf16.msra.mxu0 %v5161_v8 }
 0x2b8   : > { %2899 = vmatpush1.bf16.msra.mxu1 %v5138_v25  ;;  %v1974_v13 = vpop.f32.mrf.mxu0  ;;  %2826 = vmatprep.subr.bf16.mxu0 %v3864_v3 }
 0x2b9   : > { %2912 = vmatprep.subr.bf16.mxu1 %v3864_v3 }
 0x2ba   : > { %2751 = vmatmul.mubr.bf16.vlgmr.msra.gmra.mxu0 %v4681_v0 }
 0x2bb   : > { %v2198_v9 = vpop.f32.mrf.mxu1  ;;  %2827 = vmatpush1.bf16.msra.mxu0 %v5068_v16  ;;  %3542 = vmatprep.mubr.msk.bf16.mxu0 %vm1572_vm2, %v5163_v52 }
 0x2bc   : > { %v5210_v54 = vadd.f32 %v2198_v9, %v5043_v47  ;;  %2913 = vmatpush2.bf16.msra.mxu1 %v5147_v40  ;;  %2828 = vmatprep.subr.bf16.mxu0 %v3864_v3  ;;  %v3781_v47 = vld [vmem:[%s5335_s3] sm:$0xff]  }
 0x2bd   : > { %2914 = vmatprep.subr.bf16.mxu1 %v3864_v3  ;;  %v2200_v41 = vpop.f32.mrf.mxu1 }
 0x2be   : > { %v3782_v41 = vld [vmem:[%s5335_s3 + $0x38] sm:$0xff]  }
 0x2bf   : > { %2829 = vmatpush1.bf16.msra.mxu0 %v5081_v24  ;;  %v2201_v0 = vpop.f32.mrf.mxu1 }
 0x2c0   : > { %2915 = vmatpush2.bf16.msra.mxu1 %v5161_v8  ;;  %2830 = vmatprep.subr.bf16.mxu0 %v3864_v3 }
 0x2c1   : > { %v2202_v5 = vpop.f32.mrf.mxu1  ;;  %3594 = vmatprep.subr.bf16.mxu1 %v3868_v60 }
 0x2c3   : > { %2917 = vmatmul.mubr.bf16.vlgmr.msra.gmra.mxu1 %v2879_v43  ;;  %2831 = vmatpush1.bf16.msra.mxu0 %v5091_v26  ;;  %v3783_v43 = vld [vmem:[%s5335_s3 + $0x30] sm:$0xff]  }
 0x2c4   : > { %2832 = vmatprep.subr.bf16.mxu0 %v3864_v3  ;;  %3598 = vmatprep.mubr.msk.bf16.mxu1 %vm3869_vm5, %v3868_v60 }
 0x2c5   : > { %3595 = vmatpush3.bf16.msra.mxu1 %v3780_v50 }
 0x2c6   : > { %3596 = vmatprep.subr.bf16.mxu1 %v3868_v60 }
 0x2c7   : > { %2833 = vmatpush1.bf16.msra.mxu0 %v5100_v15 }
 0x2c8   : > { %2834 = vmatprep.subr.bf16.mxu0 %v3864_v3 }
 0x2c9   : > { %3597 = vmatpush3.bf16.msra.mxu1 %v3781_v47 }
 0x2ca   : > { %3610 = vmatprep.subr.bf16.mxu1 %v3868_v60 }
 0x2cb   : > { %2835 = vmatpush1.bf16.msra.mxu0 %v5109_v28 }
 0x2cc   : > { %2836 = vmatprep.subr.bf16.mxu0 %v3864_v3 }
 0x2cf   : > { %2837 = vmatpush1.bf16.msra.mxu0 %v5118_v30 }
 0x2d0   : > { %2838 = vmatprep.subr.bf16.mxu0 %v3864_v3 }
 0x2d3   : > { %2839 = vmatpush1.bf16.msra.mxu0 %v5127_v17 }
 0x2d4   : > { %2840 = vmatprep.subr.bf16.mxu0 %v3864_v3 }
 0x2d7   : > { %2841 = vmatpush1.bf16.msra.mxu0 %v5138_v25 }
 0x2d8   : > { %2854 = vmatprep.subr.bf16.mxu0 %v3864_v3 }
 0x2da   : > { %v2146_v39 = vpop.f32.mrf.mxu0 }
 0x2db   : > { %v2152_v42 = vadd.f32 %v2146_v39, %v4843_v53  ;;  %2855 = vmatpush2.bf16.msra.mxu0 %v5147_v40  ;;  %v2821_v53 = vsel %vm1828_vm3, %v2818_v59, %v5163_v52 }
 0x2dc   : > { %v2148_v35 = vpop.f32.mrf.mxu0  ;;  %2856 = vmatprep.subr.bf16.mxu0 %v3864_v3  ;;  %v3779_v3 = vld [vmem:[%s5335_s3 + $0x10] sm:$0xff]  }
 0x2de   : > { %v2149_v44 = vpop.f32.mrf.mxu0 }
 0x2df   : > { %2857 = vmatpush2.bf16.msra.mxu0 %v5161_v8 }
 0x2e0   : > { %v2150_v46 = vpop.f32.mrf.mxu0  ;;  %3586 = vmatprep.subr.bf16.mxu0 %v3868_v60 }
 0x2e2   : > { %2859 = vmatmul.mubr.bf16.vlgmr.msra.gmra.mxu0 %v2821_v53 }
 0x2e3   : > { %v2302_v58 = vpop.f32.mrf.mxu1  ;;  %3587 = vmatpush3.bf16.msra.mxu0 %v3778_v34  ;;  %3590 = vmatprep.mubr.msk.bf16.mxu0 %vm3869_vm5, %v3868_v60 }
 0x2e4   : > { %v2308_v1 = vadd.f32 %v2302_v58, %v2021_v36  ;;  %3588 = vmatprep.subr.bf16.mxu0 %v3868_v60 }
 0x2e5   : > { %v2304_v45 = vpop.f32.mrf.mxu1 }
 0x2e7   : > { %v2305_v7 = vpop.f32.mrf.mxu1  ;;  %3589 = vmatpush3.bf16.msra.mxu0 %v3779_v3 }
 0x2e8   : > { %3602 = vmatprep.subr.bf16.mxu0 %v3868_v60 }
 0x2e9   : > { %v2306_v12 = vpop.f32.mrf.mxu1 }
 0x302   : > { %v2250_v21 = vpop.f32.mrf.mxu0 }
 0x303   : > { %v2256_v19 = vadd.f32 %v2250_v21, %v5130_v61 }
 0x304   : > { %v2252_v38 = vpop.f32.mrf.mxu0 }
 0x306   : > { %v2253_v2 = vpop.f32.mrf.mxu0 }
 0x308   : > { %v2254_v4 = vpop.f32.mrf.mxu0 }
 0x30b   : > { %v2494_v48 = vpop.f32.mrf.mxu1 }
 0x30c   : > { %v2500_v14 = vadd.f32 %v2494_v48, %v5210_v54 }
 0x30d   : > { %v2496_v37 = vpop.f32.mrf.mxu1 }
 0x30f   : > { %v2497_v16 = vpop.f32.mrf.mxu1 }
 0x311   : > { %v2498_v18 = vpop.f32.mrf.mxu1 }
 0x32a   : > { %v2444_v20 = vpop.f32.mrf.mxu0 }
 0x32b   : > { %v2450_v22 = vadd.f32 %v2444_v20, %v2152_v42 }
 0x32c   : > { %v2446_v24 = vpop.f32.mrf.mxu0 }
 0x32e   : > { %v2447_v26 = vpop.f32.mrf.mxu0 }
 0x32f   : > { %v3569_v26 = vld [vmem:[%s5338_s6] ss:$0 sm:$0xff] }
 0x330   : > { %v2448_v15 = vpop.f32.mrf.mxu0 }
 0x333   : > { %v2610_v28 = vpop.f32.mrf.mxu1 }
 0x334   : > { %v2616_v30 = vadd.f32 %v2610_v28, %v2308_v1 }
 0x335   : > { %v2612_v17 = vpop.f32.mrf.mxu1 }
 0x337   : > { %v2613_v32 = vpop.f32.mrf.mxu1 }
 0x338   : > { %v3192_v32 = vld [vmem:[%s5339_s7] sm:$0xff] }
 0x339   : > { %v2614_v23 = vpop.f32.mrf.mxu1 }
 0x352   : > { %v2552_v61 = vpop.f32.mrf.mxu0 }
 0x353   : > { %v2558_v25 = vadd.f32 %v2552_v61, %v2256_v19 }
 0x354   : > { %v2554_v27 = vpop.f32.mrf.mxu0 }
 0x356   : > { %v2555_v29 = vpop.f32.mrf.mxu0 }
 0x358   : > { %v2556_v40 = vpop.f32.mrf.mxu0 }
 0x35b   : > { %v2802_v31 = vpop.f32.mrf.mxu1 }
 0x35c   : > { %v2808_v8 = vadd.f32 %v2802_v31, %v2500_v14 }
 0x35d   : > { %v2804_v52 = vpop.f32.mrf.mxu1 }
 0x35e   : > { %v2938_v33 = vadd.f32 %v3544_v62, %v2808_v8 }
 0x35f   : > { %v2805_v56 = vpop.f32.mrf.mxu1 }
 0x360   : > { %v2939_v49 = vmax.f32 %v2938_v33, 0.0 }
 0x361   : > { %v2806_v57 = vpop.f32.mrf.mxu1 }
 0x362   : > { %v2940_v63 = vpack.c.bf16 %v2939_v49, %v2939_v49 }
 0x364   : > { %3591 = vmatmul.mubr.msk.bf16.vlgmr.msra.gmra.mxu0 %vm1572_vm2, %v2940_v63 }
 0x365   : > { %3603 = vmatpush3.bf16.msra.mxu0 %v3784_v6  ;;  %3606 = vmatprep.mubr.msk.bf16.mxu0 %vm3869_vm5, %v3868_v60 }
 0x366   : > { %3604 = vmatprep.subr.bf16.mxu0 %v3868_v60 }
 0x369   : > { %3605 = vmatpush3.bf16.msra.mxu0 %v3785_v11 }
 0x37a   : > { %v2752_v36 = vpop.f32.mrf.mxu0 }
 0x37b   : > { %v2758_v10 = vadd.f32 %v2752_v36, %v2450_v22 }
 0x37c   : > { %v2754_v51 = vpop.f32.mrf.mxu0 }
 0x37d   : > { %v2931_v13 = vadd.f32 %v3544_v62, %v2758_v10 }
 0x37e   : > { %v2755_v59 = vpop.f32.mrf.mxu0 }
 0x37f   : > { %v2932_v9 = vmax.f32 %v2931_v13, 0.0 }
 0x380   : > { %v2756_v54 = vpop.f32.mrf.mxu0 }
 0x381   : > { %v2933_v0 = vpack.c.bf16 %v2932_v9, %v2932_v9 }
 0x383   : > { %v2918_v55 = vpop.f32.mrf.mxu1  ;;  %3599 = vmatmul.mubr.msk.bf16.vlgmr.msra.gmra.mxu1 %vm1572_vm2, %v2933_v0 }
 0x384   : > { %v2924_v5 = vadd.f32 %v2918_v55, %v2616_v30  ;;  %3611 = vmatpush3.bf16.msra.mxu1 %v3782_v41  ;;  %3614 = vmatprep.mubr.msk.bf16.mxu1 %vm3869_vm5, %v3868_v60 }
 0x385   : > { %v2920_v39 = vpop.f32.mrf.mxu1  ;;  %3612 = vmatprep.subr.bf16.mxu1 %v3868_v60 }
 0x386   : > { %v3120_v42 = vadd.f32 %v3544_v62, %v2924_v5 }
 0x387   : > { %v2921_v35 = vpop.f32.mrf.mxu1 }
 0x388   : > { %v3121_v44 = vmax.f32 %v3120_v42, 0.0  ;;  %3613 = vmatpush3.bf16.msra.mxu1 %v3783_v43 }
 0x389   : > { %v2922_v34 = vpop.f32.mrf.mxu1 }
 0x38a   : > { %v3122_v46 = vpack.c.bf16 %v3121_v44, %v3121_v44 }
 0x38c   : > { %3615 = vmatmul.mubr.msk.bf16.vlgmr.msra.gmra.mxu1 %vm1572_vm2, %v3122_v46 }
 0x3a2   : > { %v2860_v53 = vpop.f32.mrf.mxu0 }
 0x3a3   : > { %v2866_v58 = vadd.f32 %v2860_v53, %v2558_v25 }
 0x3a4   : > { %v2862_v3 = vpop.f32.mrf.mxu0 }
 0x3a5   : > { %v3056_v1 = vadd.f32 %v3544_v62, %v2866_v58 }
 0x3a6   : > { %v2863_v45 = vpop.f32.mrf.mxu0 }
 0x3a7   : > { %v3057_v7 = vmax.f32 %v3056_v1, 0.0 }
 0x3a8   : > { %v2864_v12 = vpop.f32.mrf.mxu0 }
 0x3a9   : > { %v3058_v50 = vpack.c.bf16 %v3057_v7, %v3057_v7 }
 0x3ab   : > { %3607 = vmatmul.mubr.msk.bf16.vlgmr.msra.gmra.mxu0 %vm1572_vm2, %v3058_v50 }
 0x424   : > { %v2995_v60 = vpop.f32.mrf.mxu0 }
 0x426   : > { %v3592_v47 = vpop.f32.mrf.mxu0 }
 0x428   : > { %v2998_v21 = vpop.f32.mrf.mxu0 }
 0x42a   : > { %v3593_v19 = vpop.f32.mrf.mxu0 }
 0x443   : > { %v3050_v38 = vpop.f32.mrf.mxu1 }
 0x444   : > { %v3051_v20 = vadd.f32 %v3050_v38, %v2995_v60 }
 0x445   : > { %v3600_v2 = vpop.f32.mrf.mxu1 }
 0x447   : > { %v3053_v4 = vpop.f32.mrf.mxu1 }
 0x449   : > { %v3601_v48 = vpop.f32.mrf.mxu1 }
 0x44c   : > { %v3177_v14 = vpop.f32.mrf.mxu1 }
 0x44e   : > { %v3616_v37 = vpop.f32.mrf.mxu1 }
 0x450   : > { %v3180_v16 = vpop.f32.mrf.mxu1 }
 0x452   : > { %v3617_v18 = vpop.f32.mrf.mxu1 }
 0x46b   : > { %v3113_v22 = vpop.f32.mrf.mxu0 }
 0x46c   : > { %v3119_v24 = vadd.f32 %v3113_v22, %v3051_v20 }
 0x46d   : > { %v3608_v15 = vpop.f32.mrf.mxu0 }
 0x46e   : > { %v3183_v28 = vadd.f32 %v3177_v14, %v3119_v24 }
 0x46f   : > { %v3116_v30 = vpop.f32.mrf.mxu0 }
 0x470   : > { %v3190_v17 = vadd.f32 %v3569_v26, %v3183_v28 }
 0x471   : > { %v3609_v23 = vpop.f32.mrf.mxu0 }
 0x472   : > { %v3191_v61 = vmul.f32 5.656854, %v3190_v17 }
 0x474   : > { %v3193_v25 = vadd.f32 %v3192_v32, %v3191_v61 }
 0x476   : > { %3194 = vst.msk [vmem:[%s335_s25] sm:$0xff] %vm1572_vm2, %v3193_v25 }
 0x477   : > { %3799 = shalt.err (!%p3796_p5)
}
 0x478   : > { %s3800_s16 = scalar_lea.hbm %s3208_s14, 128  ;;  %s3804_s25 = scalar_lea.hbm %s5340_s8, 256 }
 0x479   : > { %p3801_p6 = scmp.ne.s32.totalorder %s3208_s14, %s3800_s16  ;;  %p3805_p10 = scmp.lt.s32.totalorder %s3208_s14, %s5340_s8 }
 0x47a   : > { %p3806_p11 = scmp.lt.s32.totalorder %s3804_s25, %s3800_s16 }
 0x47b   : > { %p3802_p7 = pnand %p3801_p6, %p3956_p4 }
 0x47c   : > { %p3807_p12 = por %p3806_p11, %p3805_p10 }
 0x47d   : > { %p3803_p9 = pneg %p3802_p7 }
 0x47f   : > { %p3808_p13 = pnand %p3807_p12, %p3803_p9 }
 0x481   : > { %3811 = shalt.err (!%p3808_p13)
}
 0x482   : > { %3619 = dma.vmem_to_hbm [thread:$0]  (%p3956_p4), %s3211_s26, 128, %s3208_s14, %s3196_s21  }
 0x483 PF: > { %p3625_p0 = scmp.ge.s32.totalorder %s3862_s10, 2  ;;  %s3222_s22 = sand.u32 1, %s3842_s27  }
 0x484   : > { %s3223_s23 = scalar_lea.sflag [#allocation3], %s3222_s22 }
 0x485   : > { %p3622_p1 = pnand %p3625_p0, %p3963_p8 }
 0x487   : > { %p3623_p2 = pneg %p3622_p1 }
 0x489   : > { %3837 = dma.done.wait (%p3623_p2), %s3223_s23, 128  }
 0x48a   : > { %3839 = vsyncadd (%p3623_p2), %s3223_s23, 4294967168  ;;  %s21_s10 = sadd.s32 1, %s3862_s10   ;;  %s5355_s27 = smov %s3846_s28 }
 0x48b   : > { %p18_p3 = scmp.ge.s32.totalorder %s21_s10, 4   ;;  %s5356_s28 = smov %s3850_s29 }
 0x48c   : > { %s5357_s29 = smov %s3969_s18  ;;  %s5358_s30 = smov %s3858_s9 }
 0x48d   : > { %s5359_s9 = smov %s5361_s13  ;;  %20 = sbr.rel (!%p18_p3) target bundleno = 4 (0x4), region = 104 }
 0x492   :  { %3228 = vsyncpa [#allocation3], 1 }
 0x493   :  { %3230 = vsyncpa [#allocation3 + $0x1], 1 }

</bundles_post_ra>
